<compile_context>
chip_gen: v5e
topology: v5e:2x2
jax: 0.10.0
libtpu: 0.0.40
codegen_flags: <defaults>
</compile_context>

<pallas_src>
import functools

import jax
import jax.numpy as jnp
import numpy as np
from jax import lax
from jax.experimental import pallas as pl
from jax.experimental.pallas import tpu as pltpu

# ----------------------------- config (small, synthetic) ---------------------
CONFIG = dict(
    vocab_size=50,
    embed_dim=32,
    max_len=16,
    num_outputs=8,
    arch=3,
)
CNN_SIZE = 200  # hard-coded in the PyTorch module for arch == 3
KERNEL_SIZE = 3


# ----------------------------- Pallas kernel ---------------------------------
def _accentuator_fused_kernel(ids_win_ref, w2_ref, bconv_ref, wfc_ref, bfc_ref,
                              out_ref, *, lc, approx_recip):
    """Fused (embed@conv-weight) one-hot contraction + masked max-over-time +
    bias/ReLU + linear + lane-dense softmax.

    ids_win_ref: (K, Bt, L)  int32 shifted ids, ids_win[k, b, t] = ids[b, t+k]
    w2_ref:      (K*V, C)    fused weight, row k*V + v == emb[v] @ wconv[k]
    bconv_ref:   (1, C)      conv bias (f32)
    wfc_ref:     (C, Opad)   fc weight, zero-padded to 128 lanes
    bfc_ref:     (1, Opad)   fc bias, padded lanes = -1e30
    out_ref:     (Bt, Opad)  softmax probabilities (padded lanes == 0)
    """
    K, Bt, L = ids_win_ref.shape
    KV, C = w2_ref.shape
    V = KV // K

    # ---- windowed one-hot selector, built in-registers (exact 0/1) ----
    taps = []
    for k in range(K):                                   # K == 3, static
        ids_k = ids_win_ref[k]                           # (Bt, L) int32
        iota_v = lax.broadcasted_iota(jnp.int32, (Bt, L, V), 2)
        taps.append((ids_k[:, :, None] == iota_v).astype(w2_ref.dtype))
    onehot3 = jnp.concatenate(taps, axis=-1)             # (Bt, L, K*V)

    # ---- ONE MXU contraction: embedding lookup + all 3 conv taps fused ----
    conv = jnp.einsum('blf,fc->blc', onehot3, w2_ref[...],
                      preferred_element_type=jnp.float32)  # (Bt, L, C) f32

    # ---- masked max over time (positions t >= Lc hold window garbage) ----
    t_iota = lax.broadcasted_iota(jnp.int32, (Bt, L, 1), 1)
    conv = jnp.where(t_iota < lc, conv, -jnp.inf)
    # bias + ReLU hoisted past the pool (exact: +b is t-invariant, ReLU monotone)
    pooled = jnp.maximum(jnp.max(conv, axis=1) + bconv_ref[...], 0.0)  # (Bt, C)

    # ---- final linear layer (output lanes padded to 128 -> unmasked stores) --
    logits = jnp.dot(pooled.astype(wfc_ref.dtype), wfc_ref[...],
                     preferred_element_type=jnp.float32) + bfc_ref[...]

    # ---- softmax over the class axis (padded lanes -> exactly 0) ----
    m = jnp.max(logits, axis=1, keepdims=True)
    e = jnp.exp(logits - m)
    probs = e * pl.reciprocal(jnp.sum(e, axis=1, keepdims=True),
                              approx=approx_recip)
    out_ref[...] = probs.astype(out_ref.dtype)


# ----------------------------- tiling plan ------------------------------------
def _round_up(x, m):
    return ((x + m - 1) // m) * m


def _tile_plan(batch, matmul_dtype):
    """Generation-aware batch tile + explicit padding (never drops rows)."""
    try:
        kind = jax.devices()[0].device_kind.lower()
    except Exception:  # pragma: no cover - device query failure
        kind = ""
    is_v7 = "v7" in kind
    if is_v7:
        # 64 MiB VMEM per TC and 2 TCs: keep tiles small, use >= 2 grid steps.
        max_tile = 128
    else:
        # v5e/v6e have 128 MiB VMEM: amortize per-step overhead with big tiles.
        max_tile = 512 if jnp.dtype(matmul_dtype).itemsize <= 2 else 256
    n_steps = pl.cdiv(batch, max_tile)
    if is_v7 and n_steps == 1 and batch > 8:
        n_steps = 2  # make dimension_semantics=('parallel',) use both TCs
    bt = max(8, _round_up(pl.cdiv(batch, n_steps), 8))   # 8-sublane aligned
    b_padded = bt * n_steps
    vmem_limit = None if is_v7 else 64 * 1024 * 1024
    return bt, b_padded, n_steps, vmem_limit


# ----------------------------- wrapper ----------------------------------------
@functools.partial(jax.jit, static_argnames=("matmul_dtype",))
def accentuator_forward(input_ids, params, *, matmul_dtype=jnp.bfloat16):
    """Forward pass of AccentuatorModel (arch=3). Returns softmax probs (B, O)."""
    emb = params["embedding"].astype(jnp.float32)     # (V, E)
    wconv = params["wconv"].astype(jnp.float32)       # (K, E, C) tap-major
    bconv = params["bconv"].astype(jnp.float32)       # (1, C)
    wfc = params["wfc"].astype(jnp.float32)           # (C, O)
    bfc = params["bfc"].astype(jnp.float32)           # (1, O)

    B, L = input_ids.shape
    V, E = emb.shape
    K, _, C = wconv.shape
    O = wfc.shape[1]
    Lc = L - (K - 1)

    # --- W2 fusion: fold the embedding table into the conv weight (tiny) ---
    w2 = jnp.einsum("ve,kec->kvc", emb, wconv,
                    precision=lax.Precision.HIGHEST)          # (K, V, C)
    w2 = w2.reshape(K * V, C).astype(matmul_dtype)            # (K*V, C)

    # --- lane-dense output: pad fc to 128 lanes; padded lanes -> -1e30 bias ---
    O_pad = max(128, _round_up(O, 128))
    wfc_p = jnp.zeros((C, O_pad), jnp.float32).at[:, :O].set(wfc)
    wfc_p = wfc_p.astype(matmul_dtype)
    bfc_p = jnp.full((1, O_pad), -1e30, jnp.float32).at[:, :O].set(bfc)

    # --- shifted ids built wrapper-side on tiny int32 data (no in-kernel
    #     sublane-unaligned activation slices): ids_win[k, b, t] = ids[b, t+k].
    #     Positions reading past L get 0 and are masked before the pool. ---
    ids = input_ids.astype(jnp.int32)
    ids_pad = jnp.pad(ids, ((0, 0), (0, K - 1)))
    ids_win = jnp.stack([ids_pad[:, k:k + L] for k in range(K)], axis=0)

    Bt, B_padded, n_steps, vmem_limit = _tile_plan(B, matmul_dtype)
    if B_padded != B:
        ids_win = jnp.pad(ids_win, ((0, 0), (0, B_padded - B), (0, 0)))

    kernel = functools.partial(
        _accentuator_fused_kernel, lc=Lc,
        approx_recip=(jnp.dtype(matmul_dtype) != jnp.dtype(jnp.float32)))

    out = pl.pallas_call(
        kernel,
        out_shape=jax.ShapeDtypeStruct((B_padded, O_pad), jnp.float32),
        grid=(n_steps,),
        in_specs=[
            pl.BlockSpec((K, Bt, L), lambda i: (0, i, 0)),   # ids: batch-tiled
            pl.BlockSpec((K * V, C), lambda i: (0, 0)),      # fused weight
            pl.BlockSpec((1, C), lambda i: (0, 0)),
            pl.BlockSpec((C, O_pad), lambda i: (0, 0)),
            pl.BlockSpec((1, O_pad), lambda i: (0, 0)),
        ],
        out_specs=pl.BlockSpec((Bt, O_pad), lambda i: (i, 0)),
        compiler_params=pltpu.CompilerParams(
            dimension_semantics=("parallel",),
            vmem_limit_bytes=vmem_limit),
    )(ids_win, w2, bconv, wfc_p, bfc_p)

    return out[:B, :O]


# ----------------------------- reference (plain JAX) --------------------------
def accentuator_reference(input_ids, params):
    x = jnp.take(params['embedding'], input_ids, axis=0).astype(jnp.float32)
    B, L, E = x.shape
    Lc = L - (KERNEL_SIZE - 1)
    wconv, bconv = params['wconv'], params['bconv']
    acc = jnp.zeros((B, Lc, wconv.shape[2]), jnp.float32)
    for k in range(KERNEL_SIZE):
        acc = acc + jnp.einsum('ble,ec->blc', x[:, k:k + Lc, :], wconv[k])
    acc = jnp.maximum(acc + bconv[None, :, :], 0.0)
    pooled = jnp.max(acc, axis=1)
    logits = pooled @ params['wfc'] + params['bfc']
    return jax.nn.softmax(logits, axis=1)


# ----------------------------- deterministic params ---------------------------
def make_params(key):
    k_emb, k_wc, k_bc, k_wf, k_bf = jax.random.split(key, 5)
    E, C, O, V = (CONFIG['embed_dim'], CNN_SIZE, CONFIG['num_outputs'],
                  CONFIG['vocab_size'])
    return dict(
        embedding=jax.random.normal(k_emb, (V, E), jnp.float32),
        # stored tap-major: wconv[k, e, c] == torch_conv_weight[c, e, k]
        wconv=jax.random.normal(k_wc, (KERNEL_SIZE, E, C), jnp.float32) * 0.05,
        bconv=jax.random.normal(k_bc, (1, C), jnp.float32) * 0.05,
        wfc=jax.random.normal(k_wf, (C, O), jnp.float32) * 0.05,
        bfc=jax.random.normal(k_bf, (1, O), jnp.float32) * 0.05,
    )


if __name__ == "__main__":
    key = jax.random.PRNGKey(0)
    k_ids, k_params = jax.random.split(key)

    B, L = 2, CONFIG['max_len']
    input_ids = jax.random.randint(k_ids, (B, L), 0, CONFIG['vocab_size'],
                                   dtype=jnp.int32)
    params = make_params(k_params)

    ref = accentuator_reference(input_ids, params)

    # Strict numerical check: f32 matmul path (exact reciprocal).
    out_f32 = jax.block_until_ready(
        accentuator_forward(input_ids, params, matmul_dtype=jnp.float32))
    assert out_f32.shape == (B, CONFIG['num_outputs'])
    np.testing.assert_allclose(np.asarray(out_f32), np.asarray(ref),
                               rtol=1e-4, atol=1e-5)
    np.testing.assert_allclose(np.asarray(out_f32).sum(axis=1), np.ones(B),
                               rtol=1e-5, atol=1e-5)

    # Production path: bf16 matmuls (f32 accumulate), approx reciprocal.
    out_bf16 = jax.block_until_ready(accentuator_forward(input_ids, params))
    assert out_bf16.shape == (B, CONFIG['num_outputs'])
    np.testing.assert_allclose(np.asarray(out_bf16), np.asarray(ref),
                               rtol=0.0, atol=3e-2)
    np.testing.assert_allclose(np.asarray(out_bf16).sum(axis=1), np.ones(B),
                               rtol=5e-3, atol=5e-3)

    print("KERNEL_OK")
</pallas_src>

<mosaic_0001>
module attributes {stable_mosaic.version = 11 : i64} {
  func.func @_accentuator_fused_kernel(%arg0: i32, %arg1: memref<3x8x16xi32, #tpu.memory_space<vmem>>, %arg2: memref<150x200xf32, #tpu.memory_space<vmem>>, %arg3: memref<1x200xf32, #tpu.memory_space<vmem>>, %arg4: memref<200x128xf32, #tpu.memory_space<vmem>>, %arg5: memref<1x128xf32, #tpu.memory_space<vmem>>, %arg6: memref<8x128xf32, #tpu.memory_space<vmem>>) attributes {dimension_semantics = [#tpu.dimension_semantics<parallel>], iteration_bounds = array<i64: 1>, scalar_prefetch = 0 : i64, scratch_operands = 0 : i64, tpu.core_type = #tpu.core_type<tc>, window_params = [{transform_indices = @transform_0, window_bounds = array<i64: 3, 8, 16>}, {pipeline_mode = #tpu.pipeline_mode<synchronous>, transform_indices = @transform_1, window_bounds = array<i64: 150, 200>}, {pipeline_mode = #tpu.pipeline_mode<synchronous>, transform_indices = @transform_2, window_bounds = array<i64: 1, 200>}, {pipeline_mode = #tpu.pipeline_mode<synchronous>, transform_indices = @transform_3, window_bounds = array<i64: 200, 128>}, {pipeline_mode = #tpu.pipeline_mode<synchronous>, transform_indices = @transform_4, window_bounds = array<i64: 1, 128>}, {transform_indices = @transform_5, window_bounds = array<i64: 8, 128>}]} {
    %c0 = arith.constant 0 : index
    %c0_0 = arith.constant 0 : index
    %c0_1 = arith.constant 0 : index
    %0 = vector.load %arg1[%c0, %c0_0, %c0_1] : memref<3x8x16xi32, #tpu.memory_space<vmem>>, vector<1x8x16xi32>
    %1 = vector.shape_cast %0 : vector<1x8x16xi32> to vector<8x16xi32>
    %2 = tpu.iota {dimensions = array<i32: 2>} : vector<8x16x50xi32>
    %3 = vector.shape_cast %1 : vector<8x16xi32> to vector<8x16x1xi32>
    %4 = vector.broadcast %3 : vector<8x16x1xi32> to vector<8x16x50xi32>
    %5 = arith.cmpi eq, %4, %2 : vector<8x16x50xi32>
    %6 = arith.extui %5 : vector<8x16x50xi1> to vector<8x16x50xi32>
    %7 = arith.sitofp %6 : vector<8x16x50xi32> to vector<8x16x50xf32>
    %c1 = arith.constant 1 : index
    %c0_2 = arith.constant 0 : index
    %c0_3 = arith.constant 0 : index
    %8 = vector.load %arg1[%c1, %c0_2, %c0_3] : memref<3x8x16xi32, #tpu.memory_space<vmem>>, vector<1x8x16xi32>
    %9 = vector.shape_cast %8 : vector<1x8x16xi32> to vector<8x16xi32>
    %10 = tpu.iota {dimensions = array<i32: 2>} : vector<8x16x50xi32>
    %11 = vector.shape_cast %9 : vector<8x16xi32> to vector<8x16x1xi32>
    %12 = vector.broadcast %11 : vector<8x16x1xi32> to vector<8x16x50xi32>
    %13 = arith.cmpi eq, %12, %10 : vector<8x16x50xi32>
    %14 = arith.extui %13 : vector<8x16x50xi1> to vector<8x16x50xi32>
    %15 = arith.sitofp %14 : vector<8x16x50xi32> to vector<8x16x50xf32>
    %c2 = arith.constant 2 : index
    %c0_4 = arith.constant 0 : index
    %c0_5 = arith.constant 0 : index
    %16 = vector.load %arg1[%c2, %c0_4, %c0_5] : memref<3x8x16xi32, #tpu.memory_space<vmem>>, vector<1x8x16xi32>
    %17 = vector.shape_cast %16 : vector<1x8x16xi32> to vector<8x16xi32>
    %18 = tpu.iota {dimensions = array<i32: 2>} : vector<8x16x50xi32>
    %19 = vector.shape_cast %17 : vector<8x16xi32> to vector<8x16x1xi32>
    %20 = vector.broadcast %19 : vector<8x16x1xi32> to vector<8x16x50xi32>
    %21 = arith.cmpi eq, %20, %18 : vector<8x16x50xi32>
    %22 = arith.extui %21 : vector<8x16x50xi1> to vector<8x16x50xi32>
    %23 = arith.sitofp %22 : vector<8x16x50xi32> to vector<8x16x50xf32>
    %24 = tpu.concatenate %7, %15, %23 in 2 : vector<8x16x50xf32>, vector<8x16x50xf32>, vector<8x16x50xf32> -> vector<8x16x150xf32>
    %c0_6 = arith.constant 0 : index
    %c0_7 = arith.constant 0 : index
    %25 = vector.load %arg2[%c0_6, %c0_7] : memref<150x200xf32, #tpu.memory_space<vmem>>, vector<150x200xf32>
    "tpu.trace_start"() <{level = 10 : i32, message = "blf,fc->blc"}> : () -> ()
    %cst = arith.constant dense<0.000000e+00> : vector<8x16x200xf32>
    %26 = tpu.matmul %24, %25, %cst {dimension_numbers = #tpu.dot_dimension_numbers<[2], [0], [0, 1], [1], [0, 0, 0, 1, 1, 1], [], []>} : vector<8x16x150xf32>, vector<150x200xf32>, vector<8x16x200xf32> -> vector<8x16x200xf32>
    "tpu.trace_stop"() : () -> ()
    %27 = tpu.iota {dimensions = array<i32: 1>} : vector<8x16x1xi32>
    %c14_i32 = arith.constant 14 : i32
    %28 = vector.broadcast %c14_i32 : i32 to vector<8x16x1xi32>
    %29 = arith.cmpi slt, %27, %28 : vector<8x16x1xi32>
    %cst_8 = arith.constant 0xFF800000 : f32
    %30 = vector.shape_cast %29 : vector<8x16x1xi1> to vector<8x16x1xi1>
    %31 = vector.broadcast %30 : vector<8x16x1xi1> to vector<8x16x200xi1>
    %32 = vector.broadcast %cst_8 : f32 to vector<8x16x200xf32>
    %33 = arith.select %31, %26, %32 : vector<8x16x200xi1>, vector<8x16x200xf32>
    %cst_9 = arith.constant dense<0xFF800000> : vector<8x200xf32>
    %34 = vector.multi_reduction <maximumf>, %33, %cst_9 [1] : vector<8x16x200xf32> to vector<8x200xf32>
    %c0_10 = arith.constant 0 : index
    %c0_11 = arith.constant 0 : index
    %35 = vector.load %arg3[%c0_10, %c0_11] : memref<1x200xf32, #tpu.memory_space<vmem>>, vector<1x200xf32>
    %36 = vector.broadcast %35 : vector<1x200xf32> to vector<8x200xf32>
    %37 = arith.addf %34, %36 : vector<8x200xf32>
    %cst_12 = arith.constant 0.000000e+00 : f32
    %38 = vector.broadcast %cst_12 : f32 to vector<8x200xf32>
    %39 = arith.maximumf %37, %38 : vector<8x200xf32>
    %c0_13 = arith.constant 0 : index
    %c0_14 = arith.constant 0 : index
    %40 = vector.load %arg4[%c0_13, %c0_14] : memref<200x128xf32, #tpu.memory_space<vmem>>, vector<200x128xf32>
    %cst_15 = arith.constant dense<0.000000e+00> : vector<8x128xf32>
    %41 = tpu.matmul %39, %40, %cst_15 {dimension_numbers = #tpu.dot_dimension_numbers<[1], [0], [0], [1], [0, 0, 1, 1], [], []>} : vector<8x200xf32>, vector<200x128xf32>, vector<8x128xf32> -> vector<8x128xf32>
    %c0_16 = arith.constant 0 : index
    %c0_17 = arith.constant 0 : index
    %42 = vector.load %arg5[%c0_16, %c0_17] : memref<1x128xf32, #tpu.memory_space<vmem>>, vector<1x128xf32>
    %43 = vector.broadcast %42 : vector<1x128xf32> to vector<8x128xf32>
    %44 = arith.addf %41, %43 : vector<8x128xf32>
    %cst_18 = arith.constant dense<0xFF800000> : vector<8xf32>
    %45 = vector.multi_reduction <maximumf>, %44, %cst_18 [1] : vector<8x128xf32> to vector<8xf32>
    %46 = vector.shape_cast %45 : vector<8xf32> to vector<8x1xf32>
    %47 = vector.broadcast %46 : vector<8x1xf32> to vector<8x128xf32>
    %48 = arith.subf %44, %47 : vector<8x128xf32>
    %49 = math.exp %48 : vector<8x128xf32>
    %cst_19 = arith.constant dense<0.000000e+00> : vector<8xf32>
    %50 = vector.multi_reduction <add>, %49, %cst_19 [1] : vector<8x128xf32> to vector<8xf32>
    %51 = vector.shape_cast %50 : vector<8xf32> to vector<8x1xf32>
    %52 = tpu.reciprocal %51 : vector<8x1xf32> -> vector<8x1xf32>
    %53 = vector.broadcast %52 : vector<8x1xf32> to vector<8x128xf32>
    %54 = arith.mulf %49, %53 : vector<8x128xf32>
    %c0_20 = arith.constant 0 : index
    %c0_21 = arith.constant 0 : index
    %55 = vector.load %arg6[%c0_20, %c0_21] : memref<8x128xf32, #tpu.memory_space<vmem>>, vector<8x128xf32>
    tpu.vector_store %arg6[%c0_20, %c0_21], %54 {strides = array<i32>} : memref<8x128xf32, #tpu.memory_space<vmem>>, vector<8x128xf32>,
    return
  }
  func.func @transform_0(%arg0: i32) -> (i32, i32, i32) {
    %c0_i32 = arith.constant 0 : i32
    %c0_i32_0 = arith.constant 0 : i32
    %c0_i32_1 = arith.constant 0 : i32
    return %c0_i32, %arg0, %c0_i32_0 : i32, i32, i32
  }
  func.func @transform_1(%arg0: i32) -> (i32, i32) {
    %c0_i32 = arith.constant 0 : i32
    %c0_i32_0 = arith.constant 0 : i32
    %c0_i32_1 = arith.constant 0 : i32
    return %c0_i32, %c0_i32_0 : i32, i32
  }
  func.func @transform_2(%arg0: i32) -> (i32, i32) {
    %c0_i32 = arith.constant 0 : i32
    %c0_i32_0 = arith.constant 0 : i32
    %c0_i32_1 = arith.constant 0 : i32
    return %c0_i32, %c0_i32_0 : i32, i32
  }
  func.func @transform_3(%arg0: i32) -> (i32, i32) {
    %c0_i32 = arith.constant 0 : i32
    %c0_i32_0 = arith.constant 0 : i32
    %c0_i32_1 = arith.constant 0 : i32
    return %c0_i32, %c0_i32_0 : i32, i32
  }
  func.func @transform_4(%arg0: i32) -> (i32, i32) {
    %c0_i32 = arith.constant 0 : i32
    %c0_i32_0 = arith.constant 0 : i32
    %c0_i32_1 = arith.constant 0 : i32
    return %c0_i32, %c0_i32_0 : i32, i32
  }
  func.func @transform_5(%arg0: i32) -> (i32, i32) {
    %c0_i32 = arith.constant 0 : i32
    %c0_i32_0 = arith.constant 0 : i32
    return %arg0, %c0_i32 : i32, i32
  }
}

</mosaic_0001>

<bundles_post_ra>
// kernel: accentuator_forward.1
= control target key start
LH: loop header
LB: loop body
LE: loop exit
PB: predicated region body
PF: predicated region fallthrough
CT: control target
= control target key end

     0   :  { %v21_v0 = vlaneseq  ;;  %v1535_v21 = vmov 0.0   ;;  %s1537_s24 = smov 100   ;;  %s2157_s0 = inlined_call_operand.vmem [shape: s32[3,8,16], index: 0, kind: input, shape index: {}]   ;;  %s2158_s1 = inlined_call_operand.vmem [shape: f32[150,200], index: 1, kind: input, shape index: {}]   ;;  %s2159_s2 = inlined_call_operand.vmem [shape: f32[1,200], index: 2, kind: input, shape index: {}]   ;;  %s2160_s3 = inlined_call_operand.vmem [shape: f32[200,128], index: 3, kind: input, shape index: {}]   ;;  %s2161_s4 = inlined_call_operand.vmem [shape: f32[1,128], index: 4, kind: input, shape index: {}]   ;;  %s2162_s5 = inlined_call_operand.vmem [shape: f32[8,128], index: 5, kind: output, shape index: {}]  }
   0x1   :  { %v1578_v3 = vld [vmem:[%s2157_s0 + $0x8] sm:$0xff]  ;;  %v1586_v6 = vld [vmem:[%s2157_s0 + $0x10] sm:$0xff]  ;;  %v1595_v10 = vld [vmem:[%s2157_s0] sm:$0xff]  ;;  %s1536_s0 = smov 50  }
   0x2   :  { %v1568_v1 = vshrl.u32 %v21_v0, 7  ;;  %v177_v4 = vperm.slane %v1578_v3, 0  ;;  %v190_v5 = vperm.slane %v1578_v3, 1  ;;  %v331_v7 = vperm.slane %v1586_v6, 0  ;;  %v675_v59 = vld [vmem:[%s2158_s1 + $0xf0] sm:$0xff]  ;;  %v676_v60 = vld [vmem:[%s2158_s1 + $0xf8] sm:$0xff] }
   0x3   :  { %v344_v8 = vperm.slane %v1586_v6, 1  ;;  %v203_v9 = vperm.slane %v1578_v3, 2  ;;  %v23_v11 = vperm.slane %v1595_v10, 0  ;;  %v216_v12 = vperm.slane %v1578_v3, 3  ;;  %723 = vmatpush.msra.mxu0 %v675_v59  ;;  %853 = vmatpush.msra.mxu2 %v676_v60  ;;  %v673_v62 = vld [vmem:[%s2158_s1 + $0xe0] sm:$0xff]  ;;  %v674_v63 = vld [vmem:[%s2158_s1 + $0xe8] sm:$0xff] }
   0x4   :  { %1429 = vset.pattern.permute.xlu0 %v1568_v1  ;;  %v1572_v2 = vadd.s32 8, %v1568_v1  ;;  %1430 = vset.pattern.permute.xlu2 %v1568_v1  ;;  %v357_v13 = vperm.slane %v1586_v6, 2  ;;  %v383_v14 = vperm.slane %v1586_v6, 4  ;;  %v370_v15 = vperm.slane %v1586_v6, 3 }
   0x5   :  { %v229_v16 = vperm.slane %v1578_v3, 4  ;;  %v36_v17 = vperm.slane %v1595_v10, 1  ;;  %v49_v18 = vperm.slane %v1595_v10, 2  ;;  %v1615_v19 = vand.u32 127, %v21_v0  ;;  %v671_v0 = vld [vmem:[%s2158_s1 + $0xd0] sm:$0xff]  ;;  %724 = vmatpush.msra.mxu0 %v673_v62  ;;  %854 = vmatpush.msra.mxu2 %v674_v63 }
   0x6   :  { %1431 = vset.pattern.permute.xlu1 %v1572_v2  ;;  %v242_v29 = vperm.slane %v1578_v3, 5  ;;  %v62_v41 = vperm.slane %v1595_v10, 3  ;;  %v396_v44 = vperm.slane %v1586_v6, 5  ;;  %v409_v47 = vperm.slane %v1586_v6, 6 }
   0x7   :  { %v255_v49 = vperm.slane %v1578_v3, 6  ;;  %725 = vmatpush.msra.mxu0 %v671_v0  ;;  %v88_v60 = vperm.slane %v1595_v10, 5  ;;  %v422_v62 = vperm.slane %v1586_v6, 7 }
   0xc   :  { %182 = vperm.xlu0 %1429, %v177_v4   ;;  %195 = vperm.xlu2 %1430, %v190_v5  }
   0xe   :  { %188 = vperm.xlu1 %1431, %v177_v4  }
  0x14   :  { %336 = vperm.xlu0 %1429, %v331_v7   ;;  %349 = vperm.xlu2 %1430, %v344_v8  }
  0x16   :  { %342 = vperm.xlu1 %1431, %v331_v7  }
  0x1c   :  { %1432 = vset.pattern.permute.xlu0 %v1572_v2  ;;  %208 = vperm.xlu2 %1430, %v203_v9  }
  0x1e   :  { %355 = vperm.xlu1 %1431, %v344_v8  }
  0x24   :  { %201 = vperm.xlu0 %1432, %v190_v5   ;;  %28 = vperm.xlu2 %1430, %v23_v11   ;;  %v672_v5 = vld [vmem:[%s2158_s1 + $0xd8] sm:$0xff] }
  0x25   :  { %855 = vmatpush.msra.mxu2 %v672_v5 }
  0x26   :  { %1433 = vset.pattern.permute.xlu1 %v1568_v1 }
  0x2c   :  { %214 = vperm.xlu0 %1432, %v203_v9   ;;  %221 = vperm.xlu2 %1430, %v216_v12   ;;  %v669_v9 = vld [vmem:[%s2158_s1 + $0xc0] sm:$0xff] }
  0x2d   :  { %726 = vmatpush.msra.mxu0 %v669_v9 }
  0x2e   :  { %362 = vperm.xlu1 %1433, %v357_v13  }
  0x34   :  { %1436 = vset.pattern.permute.xlu2 %v1572_v2  ;;  %394 = vperm.xlu0 %1432, %v383_v14  }
  0x36   :  { %1434 = vset.pattern.permute.xlu1 %v1572_v2 }
  0x3c   :  { %227 = vperm.xlu2 %1436, %v216_v12   ;;  %1441 = vset.pattern.permute.xlu0 %v1568_v1  ;;  %v667_v12 = vld [vmem:[%s2158_s1 + $0xb0] sm:$0xff] }
  0x3d   :  { %727 = vmatpush.msra.mxu0 %v667_v12 }
  0x3e   :  { %368 = vperm.xlu1 %1434, %v357_v13  }
  0x44   :  { %1438 = vset.pattern.permute.xlu2 %v1568_v1  ;;  %375 = vperm.xlu0 %1441, %v370_v15  }
  0x46   :  { %34 = vperm.xlu1 %1434, %v23_v11   ;;  %v670_v11 = vld [vmem:[%s2158_s1 + $0xc8] sm:$0xff] }
  0x47   :  { %856 = vmatpush.msra.mxu2 %v670_v11 }
  0x4c   :  { %234 = vperm.xlu2 %1438, %v229_v16  }
  0x4e   :  { %1435 = vset.pattern.permute.xlu1 %v1568_v1 }
  0x54   :  { %1440 = vset.pattern.permute.xlu2 %v1572_v2 }
  0x56   :  { %41 = vperm.xlu1 %1435, %v36_v17  }
  0x5c   :  { %240 = vperm.xlu2 %1440, %v229_v16   ;;  %v668_v16 = vld [vmem:[%s2158_s1 + $0xb8] sm:$0xff] }
  0x5d   :  { %857 = vmatpush.msra.mxu2 %v668_v16 }
  0x5e   :  { %1437 = vset.pattern.permute.xlu1 %v1572_v2 }
  0x64   :  { %1453 = vset.pattern.permute.xlu2 %v1568_v1 }
  0x66   :  { %381 = vperm.xlu1 %1437, %v370_v15   ;;  %v196_v27 = vpop.permute.xlu2 %195  ;;  %v75_v15 = vperm.slane %v1595_v10, 4 }
  0x67   :  { %vm283_vm4 = vcmp.eq.s32.totalorder %v196_v27, %v1615_v19 }
  0x68   :  { %v1360_v35 = vsel %vm283_vm4, 1.0, %v1535_v21  ;;  %vm611_vm4 = vcmask 408576  }
  0x6e   :  { %47 = vperm.xlu1 %1437, %v36_v17   ;;  %v350_v33 = vpop.permute.xlu2 %349  ;;  %v665_v17 = vld [vmem:[%s2158_s1 + $0xa0] sm:$0xff] }
  0x6f   :  { %vm437_vm5 = vcmp.eq.s32.totalorder %v350_v33, %v1615_v19  ;;  %728 = vmatpush.msra.mxu0 %v665_v17  ;;  %v657_v33 = vld [vmem:[%s2158_s1 + $0x60] sm:$0xff] }
  0x70   :  { %v1377_v37 = vsel %vm437_vm5, 1.0, %v1535_v21  ;;  %vm683_vm5 = vcmask 179200  }
  0x76   :  { %1439 = vset.pattern.permute.xlu1 %v1568_v1  ;;  %v209_v43 = vpop.permute.xlu2 %208 }
  0x77   :  { %vm285_vm8 = vcmp.eq.s32.totalorder %v209_v43, %v1615_v19 }
  0x78   :  { %v1362_v51 = vsel %vm285_vm8, 1.0, %v1535_v21 }
  0x7e   :  { %v183_v20 = vpop.permute.xlu0 %182  ;;  %54 = vperm.xlu1 %1439, %v49_v18   ;;  %v1643_v45 = vpop.permute.xlu2 %28 }
  0x7f   :  { %vm281_vm0 = vcmp.eq.s32.totalorder %v183_v20, %v1615_v19  ;;  %v666_v20 = vld [vmem:[%s2158_s1 + $0xa8] sm:$0xff] }
  0x80   :  { %v1358_v22 = vsel %vm281_vm0, 1.0, %v1535_v21  ;;  %v189_v23 = vpop.permute.xlu1 %188  ;;  %858 = vmatpush.msra.mxu2 %v666_v20 }
  0x81   :  { %vm282_vm1 = vcmp.eq.s32.totalorder %v189_v23, %v1615_v19 }
  0x82   :  { %v1359_v24 = vsel %vm282_vm1, 1.0, %v1535_v21  ;;  %vm716_vm1 = vcmask 1045504  }
  0x83   :  { %v1442_v25 = vpack.i.bf16 %v1359_v24, %v1358_v22  ;;  %v663_v22 = vld [vmem:[%s2158_s1 + $0x90] sm:$0xff]  ;;  %v664_v24 = vld [vmem:[%s2158_s1 + $0x98] sm:$0xff] }
  0x84   :  { %729 = vmatpush.msra.mxu0 %v663_v22  ;;  %859 = vmatpush.msra.mxu2 %v664_v24 }
  0x85   :  { %1443 = vrot.lane.b32.xlu2 %v1442_v25, %s1536_s0  ;;  %v661_v25 = vld [vmem:[%s2158_s1 + $0x80] sm:$0xff] }
  0x86   :  { %v337_v26 = vpop.permute.xlu0 %336  ;;  %1452 = vset.pattern.permute.xlu1 %v1572_v2  ;;  %v222_v50 = vpop.permute.xlu2 %221  ;;  %730 = vmatpush.msra.mxu0 %v661_v25 }
  0x87   :  { %vm435_vm2 = vcmp.eq.s32.totalorder %v337_v26, %v1615_v19  ;;  %vm287_vm12 = vcmp.eq.s32.totalorder %v222_v50, %v1615_v19  ;;  %v652_v50 = vld [vmem:[%s2158_s1 + $0x38] sm:$0xff] }
  0x88   :  { %v343_v28 = vpop.permute.xlu1 %342  ;;  %v1375_v30 = vsel %vm435_vm2, 1.0, %v1535_v21  ;;  %v1364_v7 = vsel %vm287_vm12, 1.0, %v1535_v21 }
  0x89   :  { %vm436_vm3 = vcmp.eq.s32.totalorder %v343_v28, %v1615_v19  ;;  %v662_v28 = vld [vmem:[%s2158_s1 + $0x88] sm:$0xff] }
  0x8a   :  { %v1376_v31 = vsel %vm436_vm3, 1.0, %v1535_v21  ;;  %860 = vmatpush.msra.mxu2 %v662_v28  ;;  %vm127_vm3 = vcmp.eq.s32.totalorder %v1643_v45, %v1615_v19 }
  0x8b   :  { %v1447_v32 = vpack.i.bf16 %v1376_v31, %v1375_v30  ;;  %v660_v31 = vld [vmem:[%s2158_s1 + $0x78] sm:$0xff] }
  0x8c   :  { %861 = vmatpush.msra.mxu2 %v660_v31 }
  0x8d   :  { %1448 = vrot.lane.b32.xlu0 %v1447_v32, %s1537_s24  ;;  %247 = vperm.xlu2 %1453, %v242_v29  }
  0x8e   :  { %60 = vperm.xlu1 %1452, %v49_v18  }
  0x90   :  { %v356_v34 = vpop.permute.xlu1 %355 }
  0x91   :  { %vm438_vm6 = vcmp.eq.s32.totalorder %v356_v34, %v1615_v19  ;;  %v658_v34 = vld [vmem:[%s2158_s1 + $0x68] sm:$0xff] }
  0x92   :  { %v1378_v38 = vsel %vm438_vm6, 1.0, %v1535_v21  ;;  %862 = vmatpush.msra.mxu2 %v658_v34  ;;  %vm628_vm6 = vcmask 818176  }
  0x93   :  { %v1459_v42 = vpack.i.bf16 %v1378_v38, %v1377_v37 }
  0x95   :  { %388 = vperm.xlu0 %1441, %v383_v14   ;;  %1465 = vset.pattern.permute.xlu2 %v1572_v2 }
  0x96   :  { %v202_v36 = vpop.permute.xlu0 %201  ;;  %1464 = vset.pattern.permute.xlu1 %v1568_v1  ;;  %v228_v57 = vpop.permute.xlu2 %227 }
  0x97   :  { %vm284_vm7 = vcmp.eq.s32.totalorder %v202_v36, %v1615_v19  ;;  %vm288_vm13 = vcmp.eq.s32.totalorder %v228_v57, %v1615_v19  ;;  %v656_v36 = vld [vmem:[%s2158_s1 + $0x58] sm:$0xff]  ;;  %v645_v57 = vld [vmem:[%s2158_s1] sm:$0xff] }
  0x98   :  { %v1361_v39 = vsel %vm284_vm7, 1.0, %v1535_v21  ;;  %v1365_v8 = vsel %vm288_vm13, 1.0, %v1535_v21  ;;  %863 = vmatpush.msra.mxu2 %v656_v36 }
  0x99   :  { %v1454_v40 = vpack.i.bf16 %v1361_v39, %v1360_v35  ;;  %v1480_v13 = vpack.i.bf16 %v1365_v8, %v1364_v7  ;;  %v655_v35 = vld [vmem:[%s2158_s1 + $0x50] sm:$0xff]  ;;  %v653_v39 = vld [vmem:[%s2158_s1 + $0x40] sm:$0xff]  ;;  %v1341_v7 = vsel %vm127_vm3, 1.0, %v1535_v21 }
  0x9b   :  { %1455 = vrot.lane.b32.xlu2 %v1454_v40, %s1536_s0  ;;  %v681_v40 = vld [vmem:[%s2158_s1 + $0x120] sm:$0x3f] }
  0x9c   :  { %1391 = vmatpush.msk.msra.mxu1 %vm716_vm1, %v681_v40 }
  0x9d   :  { %1460 = vrot.lane.b32.xlu0 %v1459_v42, %s1537_s24  ;;  %v682_v42 = vld [vmem:[%s2158_s1 + $0x128] sm:$0x3f] }
  0x9e   :  { %67 = vperm.xlu1 %1464, %v62_v41   ;;  %v215_v48 = vpop.permute.xlu0 %214  ;;  %1408 = vmatpush.msk.msra.mxu3 %vm716_vm1, %v682_v42 }
  0x9f   :  { %vm286_vm9 = vcmp.eq.s32.totalorder %v215_v48, %v1615_v19  ;;  %v680_v48 = vld [vmem:[%s2158_s1 + $0x118] sm:$0xff] }
  0xa0   :  { %v363_v46 = vpop.permute.xlu1 %362  ;;  %v1363_v52 = vsel %vm286_vm9, 1.0, %v1535_v21  ;;  %932 = vmatpush.msra.mxu3 %v680_v48 }
  0xa1   :  { %v1467_v54 = vpack.i.bf16 %v1363_v52, %v1362_v51  ;;  %vm439_vm11 = vcmp.eq.s32.totalorder %v363_v46, %v1615_v19  ;;  %v679_v46 = vld [vmem:[%s2158_s1 + $0x110] sm:$0xff]  ;;  %v649_v51 = vld [vmem:[%s2158_s1 + $0x20] sm:$0xff]  ;;  %v650_v52 = vld [vmem:[%s2158_s1 + $0x28] sm:$0xff] }
  0xa2   :  { %v1379_v56 = vsel %vm439_vm11, 1.0, %v1535_v21  ;;  %802 = vmatpush.msra.mxu1 %v679_v46 }
  0xa3   :  { %253 = vperm.xlu2 %1465, %v242_v29   ;;  %v659_v29 = vld [vmem:[%s2158_s1 + $0x70] sm:$0xff] }
  0xa4   :  { %731 = vmatpush.msra.mxu0 %v659_v29  ;;  %v268_v29 = vperm.slane %v1578_v3, 7 }
  0xa5   :  { %401 = vperm.xlu0 %1441, %v396_v44  }
  0xa6   :  { %1466 = vset.pattern.permute.xlu1 %v1572_v2  ;;  %v235_v61 = vpop.permute.xlu2 %234  ;;  %v1697_v14 = vpop.permute.xlu0 %394  ;;  %732 = vmatpush.msra.mxu0 %v657_v33 }
  0xa7   :  { %vm289_vm14 = vcmp.eq.s32.totalorder %v235_v61, %v1615_v19  ;;  %vm444_vm8 = vcmp.eq.s32.totalorder %v1697_v14, %v1615_v19 }
  0xa8   :  { %v1366_v26 = vsel %vm289_vm14, 1.0, %v1535_v21  ;;  %733 = vmatpush.msra.mxu0 %v655_v35  ;;  %v1384_v17 = vsel %vm444_vm8, 1.0, %v1535_v21 }
  0xaa   :  { %734 = vmatpush.msra.mxu0 %v653_v39 }
  0xab   :  { %1472 = vset.pattern.permute.xlu2 %v1568_v1 }
  0xad   :  { %414 = vperm.xlu0 %1441, %v409_v47  }
  0xae   :  { %407 = vperm.xlu1 %1466, %v396_v44   ;;  %v651_v44 = vld [vmem:[%s2158_s1 + $0x30] sm:$0xff] }
  0xaf   :  { %735 = vmatpush.msra.mxu0 %v651_v44 }
  0xb0   :  { %v369_v53 = vpop.permute.xlu1 %368 }
  0xb1   :  { %vm440_vm10 = vcmp.eq.s32.totalorder %v369_v53, %v1615_v19  ;;  %736 = vmatpush.msra.mxu0 %v649_v51  ;;  %v647_v53 = vld [vmem:[%s2158_s1 + $0x10] sm:$0xff] }
  0xb2   :  { %v1380_v55 = vsel %vm440_vm10, 1.0, %v1535_v21 }
  0xb3   :  { %260 = vperm.xlu2 %1472, %v255_v49   ;;  %v1474_v58 = vpack.i.bf16 %v1380_v55, %v1379_v56  ;;  %v677_v55 = vld [vmem:[%s2158_s1 + $0x100] sm:$0xff]  ;;  %737 = vmatpush.msra.mxu0 %v647_v53  ;;  %v678_v56 = vld [vmem:[%s2158_s1 + $0x108] sm:$0xff] }
  0xb4   :  { %803 = vmatpush.msra.mxu1 %v677_v55  ;;  %933 = vmatpush.msra.mxu3 %v678_v56 }
  0xb5   :  { %1490 = vset.pattern.permute.xlu0 %v1572_v2  ;;  %738 = vmatpush.msra.mxu0 %v645_v57 }
  0xb6   :  { %1468 = vrot.lane.b32.xlu1 %v1467_v54, %s1536_s0  ;;  %v241_v18 = vpop.permute.xlu2 %240  ;;  %v376_v30 = vpop.permute.xlu0 %375  ;;  %v648_v54 = vld [vmem:[%s2158_s1 + $0x18] sm:$0xff] }
  0xb7   :  { %vm290_vm15 = vcmp.eq.s32.totalorder %v241_v18, %v1615_v19  ;;  %vm441_vm0 = vcmp.eq.s32.totalorder %v376_v30, %v1615_v19 }
  0xb8   :  { %v1680_v4 = vpop.permute.xlu1 %34  ;;  %v1367_v27 = vsel %vm290_vm15, 1.0, %v1535_v21  ;;  %v1381_v37 = vsel %vm441_vm0, 1.0, %v1535_v21 }
  0xb9   :  { %v1491_v32 = vpack.i.bf16 %v1367_v27, %v1366_v26  ;;  %vm128_vm7 = vcmp.eq.s32.totalorder %v1680_v4, %v1615_v19 }
  0xba   :  { %v1342_v16 = vsel %vm128_vm7, 1.0, %v1535_v21 }
  0xbb   :  { %1479 = vset.pattern.permute.xlu2 %v1572_v2 }
  0xbc   :  { %1475 = vrot.lane.b32.xlu2 %v1474_v58, %s1537_s24  ;;  %v646_v58 = vld [vmem:[%s2158_s1 + $0x8] sm:$0xff] }
  0xbe   :  { %73 = vperm.xlu1 %1466, %v62_v41   ;;  %v654_v41 = vld [vmem:[%s2158_s1 + $0x48] sm:$0xff] }
  0xbf   :  { %864 = vmatpush.msra.mxu2 %v654_v41 }
  0xc1   :  { %865 = vmatpush.msra.mxu2 %v652_v50 }
  0xc3   :  { %866 = vmatpush.msra.mxu2 %v650_v52 }
  0xc4   :  { %266 = vperm.xlu2 %1479, %v255_v49  }
  0xc5   :  { %867 = vmatpush.msra.mxu2 %v648_v54 }
  0xc6   :  { %1473 = vset.pattern.permute.xlu1 %v1568_v1 }
  0xc7   :  { %868 = vmatpush.msra.mxu2 %v646_v58 }
  0xc8   :  { %v1716_v23 = vpop.permute.xlu1 %41 }
  0xc9   :  { %vm129_vm10 = vcmp.eq.s32.totalorder %v1716_v23, %v1615_v19 }
  0xca   :  { %v1343_v27 = vsel %vm129_vm10, 1.0, %v1535_v21 }
  0xcc   :  { %1481 = vrot.lane.b32.xlu2 %v1480_v13, %s1536_s0 }
  0xcd   :  { %1502 = vset.pattern.permute.xlu2 %v1568_v1 }
  0xce   :  { %80 = vperm.xlu1 %1473, %v75_v15  }
  0xd6   :  { %1496 = vset.pattern.permute.xlu1 %v1572_v2 }
  0xd7   :  { %1492 = vrot.lane.b32.xlu1 %v1491_v32, %s1536_s0 }
  0xd8   :  { %v382_v38 = vpop.permute.xlu1 %381 }
  0xd9   :  { %vm442_vm2 = vcmp.eq.s32.totalorder %v382_v38, %v1615_v19 }
  0xda   :  { %v1382_v43 = vsel %vm442_vm2, 1.0, %v1535_v21 }
  0xdb   :  { %v1485_v49 = vpack.i.bf16 %v1382_v43, %v1381_v37 }
  0xdd   :  { %1486 = vrot.lane.b32.xlu0 %v1485_v49, %s1537_s24 }
  0xdf   :  { %86 = vperm.xlu1 %1496, %v75_v15   ;;  %v1444_v59 = vpop.permute.xlu2 %1443 }
  0xe0   :  { %v48_v63 = vpop.permute.xlu1 %47  ;;  %v1446_v12 = vunpack.i.h.bf16 %v1444_v59 }
  0xe1   :  { %vm130_vm11 = vcmp.eq.s32.totalorder %v48_v63, %v1615_v19 }
  0xe2   :  { %v613_v20 = vsel %vm611_vm4, %v1342_v16, %v1446_v12  ;;  %v1344_v34 = vsel %vm130_vm11, 1.0, %v1535_v21 }
  0xe5   :  { %420 = vperm.xlu0 %1490, %v409_v47   ;;  %v1445_v47 = vunpack.i.l.bf16 %v1444_v59 }
  0xe7   :  { %1504 = vset.pattern.permute.xlu1 %v1568_v1  ;;  %v1813_v61 = vpop.permute.xlu2 %247  ;;  %v612_v9 = vsel %vm611_vm4, %v1341_v7, %v1445_v47 }
  0xe8   :  { %vm291_vm14 = vcmp.eq.s32.totalorder %v1813_v61, %v1615_v19 }
  0xe9   :  { %v1368_v44 = vsel %vm291_vm14, 1.0, %v1535_v21 }
  0xed   :  { %1503 = vset.pattern.permute.xlu0 %v1568_v1 }
  0xef   :  { %93 = vperm.xlu1 %1504, %v88_v60  }
  0xf0   :  { %v1824_v11 = vpop.permute.xlu1 %54 }
  0xf1   :  { %vm131_vm2 = vcmp.eq.s32.totalorder %v1824_v11, %v1615_v19 }
  0xf2   :  { %v1345_v55 = vsel %vm131_vm2, 1.0, %v1535_v21  ;;  %vm1031_vm2 = vcmask 588800  }
  0xf5   :  { %427 = vperm.xlu0 %1503, %v422_v62   ;;  %v1456_v0 = vpop.permute.xlu2 %1455 }
  0xf6   :  { %v1457_v24 = vunpack.i.l.bf16 %v1456_v0  ;;  %v1458_v23 = vunpack.i.h.bf16 %v1456_v0 }
  0xf7   :  { %1506 = vset.pattern.permute.xlu1 %v1572_v2 }
  0xf8   :  { %v614_v30 = vsel %vm611_vm4, %v1343_v27, %v1457_v24  ;;  %v615_v35 = vsel %vm611_vm4, %v1344_v34, %v1458_v23 }
  0xfd   :  { %v1826_v45 = vpop.permute.xlu2 %253 }
  0xfe   :  { %vm292_vm15 = vcmp.eq.s32.totalorder %v1826_v45, %v1615_v19 }
  0xff   :  { %v1449_v5 = vpop.permute.xlu0 %1448  ;;  %433 = vperm.xlu1 %1506, %v422_v62   ;;  %v1369_v46 = vsel %vm292_vm15, 1.0, %v1535_v21  ;;  %v101_v62 = vperm.slane %v1595_v10, 6 }
 0x100   :  { %v1450_v8 = vunpack.i.l.bf16 %v1449_v5  ;;  %v1451_v13 = vunpack.i.h.bf16 %v1449_v5  ;;  %v1841_v14 = vpop.permute.xlu1 %60  ;;  %v1507_v50 = vpack.i.bf16 %v1369_v46, %v1368_v44 }
 0x101   :  { %vm132_vm3 = vcmp.eq.s32.totalorder %v1841_v14, %v1615_v19 }
 0x102   :  { %1392 = vmatmul.msk.f32.vlgmr.msra.gmra.mxu1 %vm683_vm5, %v1450_v8  ;;  %1409 = vmatmul.msk.f32.vlgmr.msra.gmra.mxu3 %vm683_vm5, %v1450_v8  ;;  %v629_v6 = vsel %vm628_vm6, %v612_v9, %v1450_v8  ;;  %v630_v4 = vsel %vm628_vm6, %v613_v20, %v1451_v13  ;;  %v1346_v59 = vsel %vm132_vm3, 1.0, %v1535_v21 }
 0x103   :  { %739 = vmatmul.f32.vlgmr.msra.gmra.mxu0 %v629_v6  ;;  %869 = vmatmul.f32.vlgmr.msra.gmra.mxu2 %v629_v6 }
 0x107   :  { %v389_v15 = vpop.permute.xlu0 %388  ;;  %99 = vperm.xlu1 %1506, %v88_v60   ;;  %v114_v60 = vperm.slane %v1595_v10, 7 }
 0x108   :  { %vm443_vm9 = vcmp.eq.s32.totalorder %v389_v15, %v1615_v19 }
 0x109   :  { %v1383_v18 = vsel %vm443_vm9, 1.0, %v1535_v21 }
 0x10a   :  { %v1497_v22 = vpack.i.bf16 %v1384_v17, %v1383_v18  ;;  %1393 = vmatmul.msk.f32.gmra.mxu1 %vm683_vm5, %v1451_v13  ;;  %1410 = vmatmul.msk.f32.gmra.mxu3 %vm683_vm5, %v1451_v13 }
 0x10b   :  { %742 = vmatmul.f32.gmra.mxu0 %v630_v4  ;;  %872 = vmatmul.f32.gmra.mxu2 %v630_v4 }
 0x10c   :  { %1498 = vrot.lane.b32.xlu2 %v1497_v22, %s1537_s24 }
 0x10d   :  { %v261_v25 = vpop.permute.xlu2 %260 }
 0x10e   :  { %vm293_vm0 = vcmp.eq.s32.totalorder %v261_v25, %v1615_v19 }
 0x10f   :  { %v1461_v26 = vpop.permute.xlu0 %1460  ;;  %v1370_v48 = vsel %vm293_vm0, 1.0, %v1535_v21 }
 0x110   :  { %v1462_v28 = vunpack.i.l.bf16 %v1461_v26  ;;  %v1463_v32 = vunpack.i.h.bf16 %v1461_v26  ;;  %v1852_v33 = vpop.permute.xlu1 %67 }
 0x111   :  { %vm133_vm7 = vcmp.eq.s32.totalorder %v1852_v33, %v1615_v19 }
 0x112   :  { %1394 = vmatmul.msk.f32.gmra.mxu1 %vm683_vm5, %v1462_v28  ;;  %1411 = vmatmul.msk.f32.gmra.mxu3 %vm683_vm5, %v1462_v28  ;;  %v631_v31 = vsel %vm628_vm6, %v614_v30, %v1462_v28  ;;  %v632_v36 = vsel %vm628_vm6, %v615_v35, %v1463_v32  ;;  %v1347_v7 = vsel %vm133_vm7, 1.0, %v1535_v21 }
 0x113   :  { %745 = vmatmul.f32.gmra.mxu0 %v631_v31  ;;  %875 = vmatmul.f32.gmra.mxu2 %v631_v31 }
 0x114   :  { %273 = vperm.xlu2 %1502, %v268_v29  }
 0x116   :  { %v1476_v3 = vpop.permute.xlu2 %1475 }
 0x117   :  { %v402_v37 = vpop.permute.xlu0 %401  ;;  %v1477_v38 = vunpack.i.l.bf16 %v1476_v3  ;;  %v1478_v51 = vunpack.i.h.bf16 %v1476_v3 }
 0x118   :  { %vm445_vm12 = vcmp.eq.s32.totalorder %v402_v37, %v1615_v19 }
 0x119   :  { %v1385_v40 = vsel %vm445_vm12, 1.0, %v1535_v21 }
 0x11a   :  { %1395 = vmatmul.msk.f32.gmra.mxu1 %vm683_vm5, %v1463_v32  ;;  %1412 = vmatmul.msk.f32.gmra.mxu3 %vm683_vm5, %v1463_v32 }
 0x11b   :  { %748 = vmatmul.f32.gmra.mxu0 %v632_v36  ;;  %878 = vmatmul.f32.gmra.mxu2 %v632_v36 }
 0x11c   :  { %1505 = vset.pattern.permute.xlu2 %v1572_v2 }
 0x11e   :  { %v267_v41 = vpop.permute.xlu2 %266 }
 0x11f   :  { %vm294_vm1 = vcmp.eq.s32.totalorder %v267_v41, %v1615_v19 }
 0x120   :  { %v408_v39 = vpop.permute.xlu1 %407  ;;  %v1371_v49 = vsel %vm294_vm1, 1.0, %v1535_v21  ;;  %vm987_vm1 = vcmp.lt.s32.totalorder %v1572_v2, 14 }
 0x121   :  { %vm446_vm13 = vcmp.eq.s32.totalorder %v408_v39, %v1615_v19  ;;  %v1518_v53 = vpack.i.bf16 %v1371_v49, %v1370_v48 }
 0x122   :  { %v1386_v42 = vsel %vm446_vm13, 1.0, %v1535_v21  ;;  %1396 = vmatmul.msk.f32.gmra.mxu1 %vm683_vm5, %v1477_v38  ;;  %1413 = vmatmul.msk.f32.gmra.mxu3 %vm683_vm5, %v1477_v38 }
 0x123   :  { %v1512_v43 = vpack.i.bf16 %v1386_v42, %v1385_v40 }
 0x124   :  { %279 = vperm.xlu2 %1505, %v268_v29  }
 0x125   :  { %1513 = vrot.lane.b32.xlu0 %v1512_v43, %s1537_s24 }
 0x126   :  { %v1482_v47 = vpop.permute.xlu2 %1481 }
 0x127   :  { %v1483_v10 = vunpack.i.l.bf16 %v1482_v47  ;;  %v1484_v15 = vunpack.i.h.bf16 %v1482_v47 }
 0x128   :  { %v1469_v52 = vpop.permute.xlu1 %1468 }
 0x129   :  { %v1470_v54 = vunpack.i.l.bf16 %v1469_v52  ;;  %v1471_v58 = vunpack.i.h.bf16 %v1469_v52  ;;  %v618_v6 = vsel %vm611_vm4, %v1347_v7, %v1483_v10 }
 0x12a   :  { %1397 = vmatmul.msk.f32.gmra.mxu1 %vm683_vm5, %v1478_v51  ;;  %1414 = vmatmul.msk.f32.gmra.mxu3 %vm683_vm5, %v1478_v51 }
 0x12b   :  { %v616_v56 = vsel %vm611_vm4, %v1345_v55, %v1470_v54  ;;  %v617_v61 = vsel %vm611_vm4, %v1346_v59, %v1471_v58 }
 0x12c   :  { %1508 = vrot.lane.b32.xlu2 %v1507_v50, %s1536_s0  ;;  %v633_v57 = vsel %vm628_vm6, %v616_v56, %v1477_v38  ;;  %v634_v63 = vsel %vm628_vm6, %v617_v61, %v1478_v51 }
 0x12d   :  { %1519 = vrot.lane.b32.xlu0 %v1518_v53, %s1536_s0  ;;  %751 = vmatmul.f32.gmra.mxu0 %v633_v57 }
 0x12e   :  { %881 = vmatmul.f32.gmra.mxu2 %v633_v57  ;;  %1517 = vset.pattern.permute.xlu2 %v1568_v1  ;;  %v415_v1 = vpop.permute.xlu0 %414 }
 0x12f   :  { %vm447_vm9 = vcmp.eq.s32.totalorder %v415_v1, %v1615_v19 }
 0x130   :  { %v74_v0 = vpop.permute.xlu1 %73  ;;  %v1387_v17 = vsel %vm447_vm9, 1.0, %v1535_v21  ;;  %vm1240_vm9 = vcmask 1042434  }
 0x131   :  { %vm134_vm8 = vcmp.eq.s32.totalorder %v74_v0, %v1615_v19 }
 0x132   :  { %v1348_v12 = vsel %vm134_vm8, 1.0, %v1535_v21  ;;  %vm1237_vm8 = vcmask 1041409  }
 0x133   :  { %v619_v20 = vsel %vm611_vm4, %v1348_v12, %v1484_v15 }
 0x135   :  { %119 = vperm.xlu0 %1503, %v114_v60   ;;  %754 = vmatmul.f32.gmra.mxu0 %v634_v63 }
 0x136   :  { %884 = vmatmul.f32.gmra.mxu2 %v634_v63  ;;  %106 = vperm.xlu2 %1517, %v101_v62  }
 0x13d   :  { %1529 = vset.pattern.permute.xlu0 %v1572_v2 }
 0x13e   :  { %1528 = vset.pattern.permute.xlu2 %v1572_v2 }
 0x140   :  { %v81_v5 = vpop.permute.xlu1 %80 }
 0x141   :  { %vm135_vm11 = vcmp.eq.s32.totalorder %v81_v5, %v1615_v19 }
 0x142   :  { %v1349_v25 = vsel %vm135_vm11, 1.0, %v1535_v21 }
 0x145   :  { %125 = vperm.xlu0 %1529, %v114_v60  }
 0x146   :  { %112 = vperm.xlu2 %1528, %v101_v62  }
 0x149   :  { %v1493_v45 = vpop.permute.xlu1 %1492 }
 0x14a   :  { %v1494_v24 = vunpack.i.l.bf16 %v1493_v45  ;;  %v1495_v32 = vunpack.i.h.bf16 %v1493_v45 }
 0x14c   :  { %v620_v29 = vsel %vm611_vm4, %v1349_v25, %v1494_v24 }
 0x14f   :  { %v1487_v8 = vpop.permute.xlu0 %1486 }
 0x150   :  { %v1488_v9 = vunpack.i.l.bf16 %v1487_v8  ;;  %v1489_v13 = vunpack.i.h.bf16 %v1487_v8 }
 0x151   :  { %v87_v14 = vpop.permute.xlu1 %86 }
 0x152   :  { %v635_v11 = vsel %vm628_vm6, %v618_v6, %v1488_v9  ;;  %1398 = vmatmul.msk.f32.gmra.mxu1 %vm683_vm5, %v1488_v9  ;;  %1415 = vmatmul.msk.f32.gmra.mxu3 %vm683_vm5, %v1488_v9  ;;  %v636_v4 = vsel %vm628_vm6, %v619_v20, %v1489_v13  ;;  %vm136_vm13 = vcmp.eq.s32.totalorder %v87_v14, %v1615_v19 }
 0x153   :  { %757 = vmatmul.f32.gmra.mxu0 %v635_v11  ;;  %887 = vmatmul.f32.gmra.mxu2 %v635_v11  ;;  %v1350_v33 = vsel %vm136_vm13, 1.0, %v1535_v21  ;;  %vm1243_vm13 = vcmask 1043459  }
 0x154   :  { %v621_v36 = vsel %vm611_vm4, %v1350_v33, %v1495_v32 }
 0x157   :  { %v421_v16 = vpop.permute.xlu0 %420 }
 0x158   :  { %vm448_vm10 = vcmp.eq.s32.totalorder %v421_v16, %v1615_v19 }
 0x159   :  { %v1388_v18 = vsel %vm448_vm10, 1.0, %v1535_v21 }
 0x15a   :  { %v1523_v22 = vpack.i.bf16 %v1388_v18, %v1387_v17  ;;  %1399 = vmatmul.msk.f32.gmra.mxu1 %vm683_vm5, %v1489_v13  ;;  %1416 = vmatmul.msk.f32.gmra.mxu3 %vm683_vm5, %v1489_v13 }
 0x15b   :  { %760 = vmatmul.f32.gmra.mxu0 %v636_v4  ;;  %890 = vmatmul.f32.gmra.mxu2 %v636_v4 }
 0x15c   :  { %1524 = vrot.lane.b32.xlu1 %v1523_v22, %s1537_s24 }
 0x161   :  { %v1916_v28 = vpop.permute.xlu1 %93 }
 0x162   :  { %vm137_vm3 = vcmp.eq.s32.totalorder %v1916_v28, %v1615_v19 }
 0x163   :  { %v1351_v8 = vsel %vm137_vm3, 1.0, %v1535_v21 }
 0x166   :  { %v1499_v26 = vpop.permute.xlu2 %1498 }
 0x167   :  { %v1500_v27 = vunpack.i.l.bf16 %v1499_v26  ;;  %v428_v30 = vpop.permute.xlu0 %427  ;;  %v1501_v34 = vunpack.i.h.bf16 %v1499_v26 }
 0x168   :  { %vm449_vm12 = vcmp.eq.s32.totalorder %v428_v30, %v1615_v19 }
 0x169   :  { %1400 = vmatmul.msk.f32.gmra.mxu1 %vm683_vm5, %v1500_v27  ;;  %1417 = vmatmul.msk.f32.gmra.mxu3 %vm683_vm5, %v1500_v27  ;;  %v637_v31 = vsel %vm628_vm6, %v620_v29, %v1500_v27  ;;  %v1389_v23 = vsel %vm449_vm12, 1.0, %v1535_v21  ;;  %v638_v37 = vsel %vm628_vm6, %v621_v36, %v1501_v34 }
 0x16a   :  { %763 = vmatmul.f32.gmra.mxu0 %v637_v31  ;;  %893 = vmatmul.f32.gmra.mxu2 %v637_v31 }
 0x16b   :  { %591 = vrot.lane.b32.xlu2 %v1389_v23, %s1537_s24 }
 0x16e   :  { %v274_v3 = vpop.permute.xlu2 %273 }
 0x16f   :  { %vm295_vm14 = vcmp.eq.s32.totalorder %v274_v3, %v1615_v19 }
 0x170   :  { %v1372_v35 = vsel %vm295_vm14, 1.0, %v1535_v21 }
 0x171   :  { %527 = vrot.lane.b32.xlu1 %v1372_v35, %s1536_s0  ;;  %1401 = vmatmul.msk.f32.gmra.mxu1 %vm683_vm5, %v1501_v34  ;;  %v434_v38 = vpop.permute.xlu1 %433 }
 0x172   :  { %1418 = vmatmul.msk.f32.gmra.mxu3 %vm683_vm5, %v1501_v34  ;;  %766 = vmatmul.f32.gmra.mxu0 %v638_v37  ;;  %vm450_vm15 = vcmp.eq.s32.totalorder %v434_v38, %v1615_v19 }
 0x173   :  { %896 = vmatmul.f32.gmra.mxu2 %v638_v37  ;;  %v1390_v39 = vsel %vm450_vm15, 1.0, %v1535_v21  ;;  %vm1255_vm15 = vcmask 1047559  }
 0x174   :  { %593 = vrot.lane.b32.xlu2 %v1390_v39, %s1537_s24 }
 0x179   :  { %v100_v12 = vpop.permute.xlu1 %99 }
 0x17a   :  { %vm138_vm7 = vcmp.eq.s32.totalorder %v100_v12, %v1615_v19 }
 0x17b   :  { %v1352_v28 = vsel %vm138_vm7, 1.0, %v1535_v21 }
 0x17e   :  { %v280_v40 = vpop.permute.xlu2 %279 }
 0x17f   :  { %vm296_vm0 = vcmp.eq.s32.totalorder %v280_v40, %v1615_v19  ;;  %v805_v41 = vpop.f32.mrf.mxu1  ;;  %v1153_v40 = vld [vmem:[%s2159_s2] sm:$0x3] }
 0x180   :  { %v1373_v42 = vsel %vm296_vm0, 1.0, %v1535_v21  ;;  %v740_v43 = vpop.f32.mrf.mxu0 }
 0x181   :  { %v806_v44 = vadd.f32 %v805_v41, %v740_v43  ;;  %529 = vrot.lane.b32.xlu1 %v1373_v42, %s1536_s0 }
 0x185   :  { %v935_v46 = vpop.f32.mrf.mxu3 }
 0x186   :  { %v870_v48 = vpop.f32.mrf.mxu2  ;;  %v1509_v63 = vpop.permute.xlu2 %1508 }
 0x187   :  { %v936_v49 = vadd.f32 %v935_v46, %v870_v48  ;;  %v808_v50 = vpop.f32.mrf.mxu1  ;;  %v1510_v5 = vunpack.i.l.bf16 %v1509_v63  ;;  %v1511_v24 = vunpack.i.h.bf16 %v1509_v63  ;;  %v1969_v48 = vperm.slane %v1153_v40, 0 }
 0x188   :  { %v743_v51 = vpop.f32.mrf.mxu0 }
 0x189   :  { %v809_v52 = vadd.f32 %v808_v50, %v743_v51  ;;  %v1032_v0 = vsel %vm1031_vm2, %v936_v49, -inf  ;;  %v622_v20 = vsel %vm611_vm4, %v1351_v8, %v1510_v5  ;;  %v623_v35 = vsel %vm611_vm4, %v1352_v28, %v1511_v24 }
 0x18b   :  { %v994_v53 = vsel %vm987_vm1, %v809_v52, -inf }
 0x18c   :  { %v1024_v54 = vmax.f32 %v806_v44, %v994_v53 }
 0x18d   :  { %v938_v55 = vpop.f32.mrf.mxu3 }
 0x18e   :  { %v873_v56 = vpop.f32.mrf.mxu2  ;;  %v1025_v60 = vrot.slane %v1024_v54, 4 }
 0x18f   :  { %v939_v57 = vadd.f32 %v938_v55, %v873_v56  ;;  %v811_v58 = vpop.f32.mrf.mxu1 }
 0x190   :  { %v746_v59 = vpop.f32.mrf.mxu0  ;;  %v1026_v10 = vmax.f32 %v1024_v54, %v1025_v60 }
 0x191   :  { %v995_v61 = vsel %vm987_vm1, %v939_v57, -inf  ;;  %v812_v62 = vadd.f32 %v811_v58, %v746_v59 }
 0x192   :  { %v1033_v1 = vsel %vm1031_vm2, %v995_v61, -inf  ;;  %v1027_v16 = vrot.slane %v1026_v10, 2 }
 0x193   :  { %v1034_v47 = vmax.f32 %v1032_v0, %v1033_v1 }
 0x194   :  { %v1028_v25 = vmax.f32 %v1026_v10, %v1027_v16 }
 0x195   :  { %v941_v7 = vpop.f32.mrf.mxu3  ;;  %v1035_v17 = vrot.slane %v1034_v47, 4 }
 0x196   :  { %v876_v9 = vpop.f32.mrf.mxu2  ;;  %v1029_v33 = vrot.slane %v1028_v25, 1 }
 0x197   :  { %v942_v6 = vadd.f32 %v941_v7, %v876_v9  ;;  %v814_v11 = vpop.f32.mrf.mxu1  ;;  %v1514_v45 = vpop.permute.xlu0 %1513  ;;  %v1036_v26 = vmax.f32 %v1034_v47, %v1035_v17 }
 0x198   :  { %v1515_v13 = vunpack.i.l.bf16 %v1514_v45  ;;  %v749_v15 = vpop.f32.mrf.mxu0  ;;  %v1516_v29 = vunpack.i.h.bf16 %v1514_v45  ;;  %v1030_v46 = vmax.f32 %v1028_v25, %v1029_v33 }
 0x199   :  { %v815_v18 = vadd.f32 %v814_v11, %v749_v15  ;;  %v1037_v34 = vrot.slane %v1036_v26, 2  ;;  %v1048_v36 = vsel %vm1031_vm2, %v942_v6, -inf }
 0x19a   :  { %1402 = vmatmul.msk.f32.gmra.mxu1 %vm683_vm5, %v1515_v13  ;;  %1419 = vmatmul.msk.f32.gmra.mxu3 %vm683_vm5, %v1515_v13  ;;  %v639_v22 = vsel %vm628_vm6, %v622_v20, %v1515_v13  ;;  %v640_v39 = vsel %vm628_vm6, %v623_v35, %v1516_v29  ;;  %v1159_v55 = vadd.f32 %v1969_v48, %v1030_v46 }
 0x19b   :  { %v998_v4 = vsel %vm987_vm1, %v815_v18, -inf  ;;  %769 = vmatmul.f32.gmra.mxu0 %v639_v22  ;;  %899 = vmatmul.f32.gmra.mxu2 %v639_v22  ;;  %v1038_v43 = vmax.f32 %v1036_v26, %v1037_v34 }
 0x19c   :  { %v1041_v14 = vmax.f32 %v812_v62, %v998_v4  ;;  %v1973_v62 = vperm.slane %v1153_v40, 1  ;;  %v1175_v0 = vmax.f32 %v1159_v55, 0.0 }
 0x19d   :  { %v944_v27 = vpop.f32.mrf.mxu3  ;;  %v1039_v53 = vrot.slane %v1038_v43, 1 }
 0x19e   :  { %v1042_v30 = vrot.slane %v1041_v14, 4  ;;  %v879_v31 = vpop.f32.mrf.mxu2 }
 0x19f   :  { %v945_v23 = vadd.f32 %v944_v27, %v879_v31  ;;  %v817_v52 = vpop.f32.mrf.mxu1  ;;  %v1040_v61 = vmax.f32 %v1038_v43, %v1039_v53  ;;  %v1520_v43 = vpop.permute.xlu0 %1519 }
 0x1a0   :  { %v1043_v32 = vmax.f32 %v1041_v14, %v1042_v30 }
 0x1a1   :  { %v999_v3 = vsel %vm987_vm1, %v945_v23, -inf  ;;  %v1160_v7 = vadd.f32 %v1973_v62, %v1040_v61  ;;  %v1522_v61 = vunpack.i.h.bf16 %v1520_v43 }
 0x1a2   :  { %v1044_v37 = vrot.slane %v1043_v32, 2  ;;  %v1049_v38 = vsel %vm1031_vm2, %v999_v3, -inf  ;;  %1403 = vmatmul.msk.f32.gmra.mxu1 %vm683_vm5, %v1516_v29  ;;  %1420 = vmatmul.msk.f32.gmra.mxu3 %vm683_vm5, %v1516_v29 }
 0x1a3   :  { %v1050_v41 = vmax.f32 %v1048_v36, %v1049_v38  ;;  %772 = vmatmul.f32.gmra.mxu0 %v640_v39  ;;  %902 = vmatmul.f32.gmra.mxu2 %v640_v39  ;;  %v1176_v15 = vmax.f32 %v1160_v7, 0.0  ;;  %v107_v36 = vpop.permute.xlu2 %106 }
 0x1a4   :  { %v1045_v42 = vmax.f32 %v1043_v32, %v1044_v37  ;;  %vm139_vm10 = vcmp.eq.s32.totalorder %v107_v36, %v1615_v19 }
 0x1a5   :  { %v1051_v44 = vrot.slane %v1050_v41, 4  ;;  %v947_v5 = vpop.f32.mrf.mxu3 }
 0x1a6   :  { %v1046_v49 = vrot.slane %v1045_v42, 1 }
 0x1a7   :  { %v1052_v50 = vmax.f32 %v1050_v41, %v1051_v44  ;;  %v820_v6 = vpop.f32.mrf.mxu1  ;;  %v1521_v44 = vunpack.i.l.bf16 %v1520_v43 }
 0x1a8   :  { %v1047_v51 = vmax.f32 %v1045_v42, %v1046_v49  ;;  %v1353_v49 = vsel %vm139_vm10, 1.0, %v1535_v21 }
 0x1a9   :  { %v1053_v54 = vrot.slane %v1052_v50, 2 }
 0x1aa   :  { %v1161_v56 = vadd.f32 %v1969_v48, %v1047_v51  ;;  %v752_v57 = vpop.f32.mrf.mxu0 }
 0x1ab   :  { %v1054_v58 = vmax.f32 %v1052_v50, %v1053_v54  ;;  %v818_v59 = vadd.f32 %v817_v52, %v752_v57  ;;  %v113_v52 = vpop.permute.xlu2 %112  ;;  %v624_v57 = vsel %vm611_vm4, %v1353_v49, %v1521_v44 }
 0x1ac   :  { %v1177_v60 = vmax.f32 %v1161_v56, 0.0  ;;  %vm140_vm11 = vcmp.eq.s32.totalorder %v113_v52, %v1615_v19 }
 0x1ad   :  { %v1055_v63 = vrot.slane %v1054_v58, 1  ;;  %v950_v4 = vpop.f32.mrf.mxu3 }
 0x1ae   :  { %v1236_v1 = vrot.slane %v1177_v60, 7 }
 0x1af   :  { %v1056_v47 = vmax.f32 %v1054_v58, %v1055_v63  ;;  %v1354_v63 = vsel %vm140_vm11, 1.0, %v1535_v21 }
 0x1b0   :  { %v1238_v10 = vsel %vm1237_vm8, %v1236_v1, %v1175_v0 }
 0x1b1   :  { %v1162_v8 = vadd.f32 %v1973_v62, %v1056_v47  ;;  %v882_v9 = vpop.f32.mrf.mxu2 }
 0x1b2   :  { %v948_v11 = vadd.f32 %v947_v5, %v882_v9  ;;  %v755_v45 = vpop.f32.mrf.mxu0 }
 0x1b3   :  { %v1178_v12 = vmax.f32 %v1162_v8, 0.0  ;;  %v821_v13 = vadd.f32 %v820_v6, %v755_v45  ;;  %v625_v8 = vsel %vm611_vm4, %v1354_v63, %v1522_v61  ;;  %v1211_v61 = vld [vmem:[%s2160_s3 + $0xa0] sm:$0xff]  ;;  %v1201_v63 = vld [vmem:[%s2160_s3 + $0x50] sm:$0xff] }
 0x1b4   :  { %v1064_v28 = vsel %vm1031_vm2, %v948_v11, -inf }
 0x1b5   :  { %v1257_v16 = vrot.slane %v1178_v12, 7  ;;  %v1002_v17 = vsel %vm987_vm1, %v821_v13, -inf  ;;  %v120_v12 = vpop.permute.xlu0 %119 }
 0x1b6   :  { %v1057_v18 = vmax.f32 %v818_v59, %v1002_v17  ;;  %vm141_vm12 = vcmp.eq.s32.totalorder %v120_v12, %v1615_v19 }
 0x1b7   :  { %v1258_v20 = vsel %vm1237_vm8, %v1257_v16, %v1176_v15 }
 0x1b8   :  { %v1058_v22 = vrot.slane %v1057_v18, 4 }
 0x1b9   :  { %v885_v14 = vpop.f32.mrf.mxu2 }
 0x1ba   :  { %v1059_v24 = vmax.f32 %v1057_v18, %v1058_v22  ;;  %v951_v25 = vadd.f32 %v950_v4, %v885_v14 }
 0x1bc   :  { %v1060_v26 = vrot.slane %v1059_v24, 2  ;;  %v1003_v27 = vsel %vm987_vm1, %v951_v25, -inf  ;;  %v1355_v25 = vsel %vm141_vm12, 1.0, %v1535_v21 }
 0x1bd   :  { %v1065_v29 = vsel %vm1031_vm2, %v1003_v27, -inf }
 0x1be   :  { %v1061_v30 = vmax.f32 %v1059_v24, %v1060_v26  ;;  %v1066_v31 = vmax.f32 %v1064_v28, %v1065_v29 }
 0x1c0   :  { %v1062_v23 = vrot.slane %v1061_v30, 1  ;;  %v1067_v32 = vrot.slane %v1066_v31, 4 }
 0x1c2   :  { %v1063_v33 = vmax.f32 %v1061_v30, %v1062_v23  ;;  %v1068_v34 = vmax.f32 %v1066_v31, %v1067_v32 }
 0x1c4   :  { %v1163_v3 = vadd.f32 %v1969_v48, %v1063_v33  ;;  %v1069_v35 = vrot.slane %v1068_v34, 2 }
 0x1c5   :  { %v592_v17 = vpop.permute.xlu2 %591 }
 0x1c6   :  { %v1179_v37 = vmax.f32 %v1163_v3, 0.0  ;;  %v1070_v38 = vmax.f32 %v1068_v34, %v1069_v35 }
 0x1c8   :  { %v1239_v39 = vrot.slane %v1179_v37, 6  ;;  %v1071_v40 = vrot.slane %v1070_v38, 1  ;;  %v126_v37 = vpop.permute.xlu0 %125 }
 0x1c9   :  { %vm142_vm14 = vcmp.eq.s32.totalorder %v126_v37, %v1615_v19  ;;  %v1206_v19 = vld [vmem:[%s2160_s3 + $0x78] sm:$0xff] }
 0x1ca   :  { %v1072_v41 = vmax.f32 %v1070_v38, %v1071_v40  ;;  %v1988_v42 = vsel %vm1240_vm9, %v1239_v39, %v1238_v10  ;;  %v1215_v40 = vld [vmem:[%s2160_s3 + $0xc0] sm:$0xff]  ;;  %v1356_v49 = vsel %vm142_vm14, 1.0, %v1535_v21  ;;  %1274 = vmatpush.msrb.mxu1 %v1206_v19  ;;  %v1205_v21 = vld [vmem:[%s2160_s3 + $0x70] sm:$0xff] }
 0x1cb   :  { %1301 = vmatpush.msrb.mxu3 %v1215_v40 }
 0x1cc   :  { %v1164_v46 = vadd.f32 %v1973_v62, %v1072_v41  ;;  %1275 = vmatpush.msrb.mxu1 %v1205_v21 }
 0x1ce   :  { %v1180_v50 = vmax.f32 %v1164_v46, 0.0  ;;  %v1525_v51 = vpop.permute.xlu1 %1524  ;;  %v594_v32 = vpop.permute.xlu2 %593 }
 0x1cf   :  { %v1526_v53 = vunpack.i.l.bf16 %v1525_v51  ;;  %v823_v54 = vpop.f32.mrf.mxu1  ;;  %v1527_v0 = vunpack.i.h.bf16 %v1525_v51 }
 0x1d0   :  { %v1259_v55 = vrot.slane %v1180_v50, 6  ;;  %v758_v56 = vpop.f32.mrf.mxu0 }
 0x1d1   :  { %v824_v58 = vadd.f32 %v823_v54, %v758_v56  ;;  %1404 = vmatmul.msk.f32.gmra.mxu1 %vm683_vm5, %v1526_v53  ;;  %1421 = vmatmul.msk.f32.gmra.mxu3 %vm683_vm5, %v1526_v53  ;;  %v641_v59 = vsel %vm628_vm6, %v624_v57, %v1526_v53  ;;  %v642_v6 = vsel %vm628_vm6, %v625_v8, %v1527_v0  ;;  %v1204_v56 = vld [vmem:[%s2160_s3 + $0x68] sm:$0xff]  ;;  %v1203_v57 = vld [vmem:[%s2160_s3 + $0x60] sm:$0xff] }
 0x1d2   :  { %775 = vmatmul.f32.gmra.mxu0 %v641_v59  ;;  %905 = vmatmul.f32.gmra.mxu2 %v641_v59  ;;  %v1998_v60 = vsel %vm1240_vm9, %v1259_v55, %v1258_v20  ;;  %v1214_v55 = vld [vmem:[%s2160_s3 + $0xb8] sm:$0xff]  ;;  %v1212_v59 = vld [vmem:[%s2160_s3 + $0xa8] sm:$0xff] }
 0x1d3   :  { %1302 = vmatpush.msrb.mxu3 %v1214_v55  ;;  %1276 = vmatpush.msrb.mxu1 %v1204_v56 }
 0x1d5   :  { %v953_v1 = vpop.f32.mrf.mxu3  ;;  %1277 = vmatpush.msrb.mxu1 %v1203_v57 }
 0x1d6   :  { %v888_v47 = vpop.f32.mrf.mxu2 }
 0x1d7   :  { %v954_v5 = vadd.f32 %v953_v1, %v888_v47  ;;  %v826_v10 = vpop.f32.mrf.mxu1 }
 0x1d8   :  { %v761_v7 = vpop.f32.mrf.mxu0 }
 0x1d9   :  { %v827_v9 = vadd.f32 %v826_v10, %v761_v7  ;;  %1405 = vmatmul.msk.f32.gmra.mxu1 %vm683_vm5, %v1527_v0  ;;  %1422 = vmatmul.msk.f32.gmra.mxu3 %vm683_vm5, %v1527_v0  ;;  %v1080_v4 = vsel %vm1031_vm2, %v954_v5, -inf  ;;  %v1200_v0 = vld [vmem:[%s2160_s3 + $0x48] sm:$0xff]  ;;  %v1199_v10 = vld [vmem:[%s2160_s3 + $0x40] sm:$0xff] }
 0x1da   :  { %778 = vmatmul.f32.gmra.mxu0 %v642_v6  ;;  %908 = vmatmul.f32.gmra.mxu2 %v642_v6 }
 0x1db   :  { %v1006_v11 = vsel %vm987_vm1, %v827_v9, -inf }
 0x1dc   :  { %v1073_v45 = vmax.f32 %v824_v58, %v1006_v11  ;;  %v1213_v58 = vld [vmem:[%s2160_s3 + $0xb0] sm:$0xff] }
 0x1dd   :  { %v956_v13 = vpop.f32.mrf.mxu3  ;;  %1303 = vmatpush.msrb.mxu3 %v1213_v58 }
 0x1de   :  { %v1074_v15 = vrot.slane %v1073_v45, 4  ;;  %v891_v16 = vpop.f32.mrf.mxu2 }
 0x1df   :  { %v957_v18 = vadd.f32 %v956_v13, %v891_v16  ;;  %1304 = vmatpush.msrb.mxu3 %v1212_v59 }
 0x1e0   :  { %v1075_v20 = vmax.f32 %v1073_v45, %v1074_v15 }
 0x1e1   :  { %v1007_v22 = vsel %vm987_vm1, %v957_v18, -inf  ;;  %1406 = vmatmul.msk.f32.gmra.mxu1 %vm683_vm5, %v592_v17  ;;  %1423 = vmatmul.msk.f32.gmra.mxu3 %vm683_vm5, %v592_v17  ;;  %v1198_v18 = vld [vmem:[%s2160_s3 + $0x38] sm:$0xff] }
 0x1e2   :  { %v1076_v14 = vrot.slane %v1075_v20, 2  ;;  %v1081_v24 = vsel %vm1031_vm2, %v1007_v22, -inf  ;;  %1305 = vmatpush.msrb.mxu3 %v1211_v61 }
 0x1e3   :  { %v1082_v26 = vmax.f32 %v1080_v4, %v1081_v24  ;;  %v528_v27 = vpop.permute.xlu1 %527  ;;  %v1197_v24 = vld [vmem:[%s2160_s3 + $0x30] sm:$0xff] }
 0x1e4   :  { %v1077_v28 = vmax.f32 %v1075_v20, %v1076_v14  ;;  %v626_v29 = vsel %vm611_vm4, %v1355_v25, %v528_v27  ;;  %v1210_v20 = vld [vmem:[%s2160_s3 + $0x98] sm:$0xff]  ;;  %v1196_v25 = vld [vmem:[%s2160_s3 + $0x28] sm:$0xff] }
 0x1e5   :  { %v1083_v30 = vrot.slane %v1082_v26, 4  ;;  %v643_v31 = vsel %vm628_vm6, %v626_v29, %v592_v17  ;;  %1306 = vmatpush.msrb.mxu3 %v1210_v20 }
 0x1e6   :  { %v1078_v23 = vrot.slane %v1077_v28, 1  ;;  %781 = vmatmul.f32.gmra.mxu0 %v643_v31  ;;  %911 = vmatmul.f32.gmra.mxu2 %v643_v31  ;;  %v829_v1 = vpop.f32.mrf.mxu1 }
 0x1e7   :  { %v1084_v33 = vmax.f32 %v1082_v26, %v1083_v30  ;;  %v764_v47 = vpop.f32.mrf.mxu0  ;;  %v1209_v26 = vld [vmem:[%s2160_s3 + $0x90] sm:$0xff] }
 0x1e8   :  { %v1079_v34 = vmax.f32 %v1077_v28, %v1078_v23  ;;  %1307 = vmatpush.msrb.mxu3 %v1209_v26  ;;  %v1195_v28 = vld [vmem:[%s2160_s3 + $0x20] sm:$0xff] }
 0x1e9   :  { %v1085_v3 = vrot.slane %v1084_v33, 2  ;;  %1407 = vmatmul.msk.f32.gmra.mxu1 %vm683_vm5, %v594_v32  ;;  %1424 = vmatmul.msk.f32.gmra.mxu3 %vm683_vm5, %v594_v32  ;;  %vm1249_vm5 = vcmask 1045509  }
 0x1ea   :  { %v1165_v35 = vadd.f32 %v1969_v48, %v1079_v34 }
 0x1eb   :  { %v1086_v36 = vmax.f32 %v1084_v33, %v1085_v3 }
 0x1ec   :  { %v1181_v38 = vmax.f32 %v1165_v35, 0.0  ;;  %v959_v5 = vpop.f32.mrf.mxu3 }
 0x1ed   :  { %v1087_v39 = vrot.slane %v1086_v36, 1  ;;  %v894_v7 = vpop.f32.mrf.mxu2 }
 0x1ee   :  { %v1242_v41 = vrot.slane %v1181_v38, 5  ;;  %v832_v8 = vpop.f32.mrf.mxu1  ;;  %v960_v19 = vadd.f32 %v959_v5, %v894_v7  ;;  %v1193_v7 = vld [vmem:[%s2160_s3 + $0x10] sm:$0xff] }
 0x1ef   :  { %v1088_v43 = vmax.f32 %v1086_v36, %v1087_v39  ;;  %v767_v9 = vpop.f32.mrf.mxu0  ;;  %v830_v39 = vadd.f32 %v829_v1, %v764_v47 }
 0x1f0   :  { %v2026_v44 = vsel %vm1243_vm13, %v1242_v41, %v1988_v42 }
 0x1f1   :  { %v1166_v46 = vadd.f32 %v1973_v62, %v1088_v43 }
 0x1f3   :  { %v1182_v50 = vmax.f32 %v1166_v46, 0.0  ;;  %v530_v51 = vpop.permute.xlu1 %529 }
 0x1f4   :  { %v627_v52 = vsel %vm611_vm4, %v1356_v49, %v530_v51  ;;  %vm1246_vm4 = vcmask 1044484  }
 0x1f5   :  { %v1261_v53 = vrot.slane %v1182_v50, 5  ;;  %v644_v54 = vsel %vm628_vm6, %v627_v52, %v594_v32  ;;  %v962_v6 = vpop.f32.mrf.mxu3  ;;  %v833_v32 = vadd.f32 %v832_v8, %v767_v9  ;;  %vm1252_vm6 = vcmask 1046534  }
 0x1f6   :  { %784 = vmatmul.f32.gmra.mxu0 %v644_v54  ;;  %914 = vmatmul.f32.gmra.mxu2 %v644_v54  ;;  %v897_v11 = vpop.f32.mrf.mxu2  ;;  %v1208_v54 = vld [vmem:[%s2160_s3 + $0x88] sm:$0xff] }
 0x1f7   :  { %v2037_v42 = vsel %vm1243_vm13, %v1261_v53, %v1998_v60  ;;  %v1202_v60 = vld [vmem:[%s2160_s3 + $0x58] sm:$0xff]  ;;  %v1010_v35 = vsel %vm987_vm1, %v833_v32, -inf  ;;  %v963_v36 = vadd.f32 %v962_v6, %v897_v11  ;;  %1308 = vmatpush.msrb.mxu3 %v1208_v54 }
 0x1f8   :  { %1278 = vmatpush.msrb.mxu1 %v1202_v60  ;;  %v1089_v49 = vmax.f32 %v830_v39, %v1010_v35  ;;  %v1194_v53 = vld [vmem:[%s2160_s3 + $0x18] sm:$0xff] }
 0x1f9   :  { %v1011_v52 = vsel %vm987_vm1, %v963_v36, -inf }
 0x1fa   :  { %1279 = vmatpush.msrb.mxu1 %v1201_v63  ;;  %v1090_v58 = vrot.slane %v1089_v49, 4  ;;  %v1097_v59 = vsel %vm1031_vm2, %v1011_v52, -inf }
 0x1fc   :  { %1280 = vmatpush.msrb.mxu1 %v1200_v0  ;;  %v1096_v0 = vsel %vm1031_vm2, %v960_v19, -inf  ;;  %v1091_v8 = vmax.f32 %v1089_v49, %v1090_v58 }
 0x1fd   :  { %v1098_v5 = vmax.f32 %v1096_v0, %v1097_v59 }
 0x1fe   :  { %1281 = vmatpush.msrb.mxu1 %v1199_v10 }
 0x200   :  { %1282 = vmatpush.msrb.mxu1 %v1198_v18  ;;  %v1099_v18 = vrot.slane %v1098_v5, 4 }
 0x202   :  { %1283 = vmatpush.msrb.mxu1 %v1197_v24  ;;  %v1100_v26 = vmax.f32 %v1098_v5, %v1099_v18 }
 0x204   :  { %1284 = vmatpush.msrb.mxu1 %v1196_v25 }
 0x206   :  { %1285 = vmatpush.msrb.mxu1 %v1195_v28 }
 0x208   :  { %1286 = vmatpush.msrb.mxu1 %v1194_v53 }
 0x20a   :  { %1287 = vmatpush.msrb.mxu1 %v1193_v7 }
 0x217   :  { %v835_v45 = vpop.f32.mrf.mxu1 }
 0x218   :  { %v770_v12 = vpop.f32.mrf.mxu0 }
 0x219   :  { %v836_v40 = vadd.f32 %v835_v45, %v770_v12 }
 0x21d   :  { %v965_v13 = vpop.f32.mrf.mxu3 }
 0x21e   :  { %v900_v15 = vpop.f32.mrf.mxu2 }
 0x21f   :  { %v838_v16 = vpop.f32.mrf.mxu1  ;;  %v966_v56 = vadd.f32 %v965_v13, %v900_v15  ;;  %v1192_v13 = vld [vmem:[%s2160_s3 + $0x8] sm:$0xff] }
 0x220   :  { %v773_v17 = vpop.f32.mrf.mxu0  ;;  %1288 = vmatpush.msrb.mxu1 %v1192_v13 }
 0x221   :  { %v839_v33 = vadd.f32 %v838_v16, %v773_v17  ;;  %v1112_v10 = vsel %vm1031_vm2, %v966_v56, -inf  ;;  %v1207_v16 = vld [vmem:[%s2160_s3 + $0x80] sm:$0xff] }
 0x222   :  { %v1191_v17 = vld [vmem:[%s2160_s3] sm:$0xff]  ;;  %1309 = vmatpush.msrb.mxu3 %v1207_v16 }
 0x223   :  { %v1014_v37 = vsel %vm987_vm1, %v839_v33, -inf  ;;  %1289 = vmatpush.msrb.mxu1 %v1191_v17 }
 0x224   :  { %v1105_v50 = vmax.f32 %v836_v40, %v1014_v37 }
 0x225   :  { %v968_v22 = vpop.f32.mrf.mxu3 }
 0x226   :  { %v903_v4 = vpop.f32.mrf.mxu2  ;;  %v1106_v60 = vrot.slane %v1105_v50, 4 }
 0x227   :  { %v969_v41 = vadd.f32 %v968_v22, %v903_v4  ;;  %v1092_v22 = vrot.slane %v1091_v8, 2 }
 0x228   :  { %v1107_v9 = vmax.f32 %v1105_v50, %v1106_v60 }
 0x229   :  { %v1015_v21 = vsel %vm987_vm1, %v969_v41, -inf  ;;  %v1093_v28 = vmax.f32 %v1091_v8, %v1092_v22 }
 0x22a   :  { %v1113_v63 = vsel %vm1031_vm2, %v1015_v21, -inf  ;;  %v1108_v4 = vrot.slane %v1107_v9, 2 }
 0x22b   :  { %v1114_v6 = vmax.f32 %v1112_v10, %v1113_v63  ;;  %v1094_v35 = vrot.slane %v1093_v28, 1 }
 0x24e   :  { %v841_v14 = vpop.f32.mrf.mxu1 }
 0x24f   :  { %v776_v27 = vpop.f32.mrf.mxu0 }
 0x250   :  { %v842_v51 = vadd.f32 %v841_v14, %v776_v27  ;;  %v1115_v14 = vrot.slane %v1114_v6, 4 }
 0x254   :  { %v971_v29 = vpop.f32.mrf.mxu3 }
 0x255   :  { %v906_v30 = vpop.f32.mrf.mxu2 }
 0x256   :  { %v844_v31 = vpop.f32.mrf.mxu1  ;;  %v972_v61 = vadd.f32 %v971_v29, %v906_v30  ;;  %v1109_v29 = vmax.f32 %v1107_v9, %v1108_v4  ;;  %v1116_v30 = vmax.f32 %v1114_v6, %v1115_v14 }
 0x257   :  { %v779_v23 = vpop.f32.mrf.mxu0 }
 0x258   :  { %v845_v34 = vadd.f32 %v844_v31, %v779_v23  ;;  %v1128_v11 = vsel %vm1031_vm2, %v972_v61, -inf  ;;  %v1110_v36 = vrot.slane %v1109_v29, 1  ;;  %v1117_v37 = vrot.slane %v1116_v30, 2 }
 0x25a   :  { %v1018_v43 = vsel %vm987_vm1, %v845_v34, -inf  ;;  %v1101_v34 = vrot.slane %v1100_v26, 2  ;;  %v1111_v52 = vmax.f32 %v1109_v29, %v1110_v36  ;;  %v1118_v53 = vmax.f32 %v1116_v30, %v1117_v37 }
 0x25b   :  { %v1121_v55 = vmax.f32 %v842_v51, %v1018_v43  ;;  %v1095_v51 = vmax.f32 %v1093_v28, %v1094_v35 }
 0x25c   :  { %v974_v3 = vpop.f32.mrf.mxu3  ;;  %v1169_v61 = vadd.f32 %v1969_v48, %v1111_v52  ;;  %v1119_v63 = vrot.slane %v1118_v53, 1 }
 0x25d   :  { %v909_v38 = vpop.f32.mrf.mxu2  ;;  %v1122_v1 = vrot.slane %v1121_v55, 4  ;;  %v1167_v60 = vadd.f32 %v1969_v48, %v1095_v51  ;;  %v1530_v51 = vld [vmem:[%s2161_s4] ss:$0 sm:$0xff] }
 0x25e   :  { %v975_v46 = vadd.f32 %v974_v3, %v909_v38  ;;  %v847_v12 = vpop.f32.mrf.mxu1  ;;  %v1185_v16 = vmax.f32 %v1169_v61, 0.0 }
 0x25f   :  { %v1123_v15 = vmax.f32 %v1121_v55, %v1122_v1 }
 0x260   :  { %v1019_v57 = vsel %vm987_vm1, %v975_v46, -inf  ;;  %v1102_v46 = vmax.f32 %v1100_v26, %v1101_v34 }
 0x261   :  { %v1129_v47 = vsel %vm1031_vm2, %v1019_v57, -inf  ;;  %v1124_v25 = vrot.slane %v1123_v15, 2 }
 0x262   :  { %v1130_v45 = vmax.f32 %v1128_v11, %v1129_v47  ;;  %v1103_v58 = vrot.slane %v1102_v46, 1  ;;  %v1183_v11 = vmax.f32 %v1167_v60, 0.0 }
 0x263   :  { %v782_v20 = vpop.f32.mrf.mxu0  ;;  %v1125_v33 = vmax.f32 %v1123_v15, %v1124_v25  ;;  %v1248_v25 = vrot.slane %v1185_v16, 3 }
 0x264   :  { %v1131_v24 = vrot.slane %v1130_v45, 4  ;;  %v977_v27 = vpop.f32.mrf.mxu3  ;;  %v848_v40 = vadd.f32 %v847_v12, %v782_v20  ;;  %v1104_v9 = vmax.f32 %v1102_v46, %v1103_v58  ;;  %v1245_v22 = vrot.slane %v1183_v11, 4 }
 0x265   :  { %v1126_v41 = vrot.slane %v1125_v33, 1 }
 0x266   :  { %v1132_v31 = vmax.f32 %v1130_v45, %v1131_v24  ;;  %v850_v32 = vpop.f32.mrf.mxu1  ;;  %v1120_v45 = vmax.f32 %v1118_v53, %v1119_v63  ;;  %v1168_v18 = vadd.f32 %v1973_v62, %v1104_v9 }
 0x267   :  { %v1127_v56 = vmax.f32 %v1125_v33, %v1126_v41 }
 0x268   :  { %v1133_v39 = vrot.slane %v1132_v31, 2  ;;  %v1170_v4 = vadd.f32 %v1973_v62, %v1120_v45  ;;  %v1184_v29 = vmax.f32 %v1168_v18, 0.0 }
 0x269   :  { %v912_v23 = vpop.f32.mrf.mxu2  ;;  %v1171_v8 = vadd.f32 %v1969_v48, %v1127_v56 }
 0x26a   :  { %v1134_v54 = vmax.f32 %v1132_v31, %v1133_v39  ;;  %v978_v19 = vadd.f32 %v977_v27, %v912_v23  ;;  %v1247_v23 = vsel %vm1246_vm4, %v1245_v22, %v2026_v44  ;;  %v1263_v36 = vrot.slane %v1184_v29, 4 }
 0x26b   :  { %v1187_v2 = vmax.f32 %v1171_v8, 0.0  ;;  %v1250_v33 = vsel %vm1249_vm5, %v1248_v25, %v1247_v23 }
 0x26c   :  { %v980_v50 = vpop.f32.mrf.mxu3  ;;  %v1135_v1 = vrot.slane %v1134_v54, 1  ;;  %v1144_v47 = vsel %vm1031_vm2, %v978_v19, -inf  ;;  %v1264_v44 = vsel %vm1246_vm4, %v1263_v36, %v2037_v42 }
 0x26d   :  { %v1251_v28 = vrot.slane %v1187_v2, 2 }
 0x26e   :  { %v1136_v13 = vmax.f32 %v1134_v54, %v1135_v1 }
 0x26f   :  { %v1253_v35 = vsel %vm1252_vm6, %v1251_v28, %v1250_v33 }
 0x270   :  { %v1172_v26 = vadd.f32 %v1973_v62, %v1136_v13 }
 0x273   :  { %v785_v3 = vpop.f32.mrf.mxu0 }
 0x274   :  { %v851_v38 = vadd.f32 %v850_v32, %v785_v3  ;;  %v1186_v32 = vmax.f32 %v1170_v4, 0.0 }
 0x276   :  { %v1022_v43 = vsel %vm987_vm1, %v851_v38, -inf  ;;  %v1265_v39 = vrot.slane %v1186_v32, 3 }
 0x277   :  { %v1137_v49 = vmax.f32 %v848_v40, %v1022_v43 }
 0x278   :  { %v1266_v43 = vsel %vm1249_vm5, %v1265_v39, %v1264_v44 }
 0x279   :  { %v1138_v21 = vrot.slane %v1137_v49, 4  ;;  %v915_v55 = vpop.f32.mrf.mxu2 }
 0x27a   :  { %v981_v57 = vadd.f32 %v980_v50, %v915_v55 }
 0x27b   :  { %v1139_v59 = vmax.f32 %v1137_v49, %v1138_v21 }
 0x27c   :  { %v1023_v0 = vsel %vm987_vm1, %v981_v57, -inf }
 0x27d   :  { %v1140_v5 = vrot.slane %v1139_v59, 2  ;;  %v1145_v10 = vsel %vm1031_vm2, %v1023_v0, -inf }
 0x27e   :  { %v1146_v7 = vmax.f32 %v1144_v47, %v1145_v10 }
 0x27f   :  { %v1141_v6 = vmax.f32 %v1139_v59, %v1140_v5 }
 0x280   :  { %v1147_v12 = vrot.slane %v1146_v7, 4 }
 0x281   :  { %v1142_v15 = vrot.slane %v1141_v6, 1 }
 0x282   :  { %v1148_v17 = vmax.f32 %v1146_v7, %v1147_v12 }
 0x283   :  { %v1143_v20 = vmax.f32 %v1141_v6, %v1142_v15 }
 0x284   :  { %v1149_v14 = vrot.slane %v1148_v17, 2 }
 0x285   :  { %v1173_v24 = vadd.f32 %v1969_v48, %v1143_v20  ;;  %v1188_v48 = vmax.f32 %v1172_v26, 0.0 }
 0x286   :  { %v1150_v27 = vmax.f32 %v1148_v17, %v1149_v14 }
 0x287   :  { %v1189_v30 = vmax.f32 %v1173_v24, 0.0  ;;  %v1267_v40 = vrot.slane %v1188_v48, 2 }
 0x288   :  { %v1151_v31 = vrot.slane %v1150_v27, 1 }
 0x289   :  { %v1254_v34 = vrot.slane %v1189_v30, 1  ;;  %v1268_v49 = vsel %vm1252_vm6, %v1267_v40, %v1266_v43 }
 0x28a   :  { %v1152_v3 = vmax.f32 %v1150_v27, %v1151_v31 }
 0x28b   :  { %v1256_v37 = vsel %vm1255_vm15, %v1254_v34, %v1253_v35 }
 0x28c   :  { %1290 = vmatmul.f32.vlgmr.msrb.gmra.mxu1 %v1256_v37  ;;  %v1174_v38 = vadd.f32 %v1973_v62, %v1152_v3 }
 0x28e   :  { %v1190_v41 = vmax.f32 %v1174_v38, 0.0 }
 0x290   :  { %v1269_v46 = vrot.slane %v1190_v41, 1 }
 0x292   :  { %v1270_v50 = vsel %vm1255_vm15, %v1269_v46, %v1268_v49 }
 0x293   :  { %1425 = vmatmul.msk.f32.vlgmr.msrb.gmra.mxu3 %vm1031_vm2, %v1270_v50 }
 0x309   :  { %v1291_v62 = vpop.f32.mrf.mxu1 }
 0x30a   :  { %v1292_v52 = vadd.f32 %v1530_v51, %v1291_v62 }
 0x316   :  { %v1311_v53 = vpop.f32.mrf.mxu3 }
 0x317   :  { %v1312_v54 = vadd.f32 %v1311_v53, %v1292_v52 }
 0x319   :  { %1314 = vmax.xlane.f32.xlu1 %v1312_v54 }
 0x38c   :  { %v1315_v19 = vpop.xlane.xlu1 %1314 }
 0x38d   :  { %v1316_v42 = vsub.f32 %v1312_v54, %v1315_v19 }
 0x38f   :  { %v1317_v21 = vmul.f32 1.442695, %v1316_v42 }
 0x391   :  { %1531 = vpow2.f32 %v1317_v21 }
 0x397   :  { %v1532_v55 = vpop.eup %1531 }
 0x398   :  { %1319 = vadd.xlane.f32.xlu2 %v1532_v55 }
 0x40b   :  { %v1320_v56 = vpop.xlane.xlu2 %1319 }
 0x40c   :  { %1533 = vrcp.f32 %v1320_v56  ;;  %v1332_v60 = vand.u32 2147483648, %v1320_v56  ;;  %v1330_v63 = vand.u32 2147483647, %v1320_v56  ;;  %vm1326_vm1 = vweird.f32 %v1320_v56 }
 0x40e   :  { %v1333_v1 = vor.u32 1.1754944e-38, %v1332_v60  ;;  %vm1331_vm3 = vcmp.eq.f32.partialorder %v1330_v63, 8.507059e+37 }
 0x412   :  { %v1534_v57 = vpop.eup %1533 }
 0x413   :  { %v1322_v58 = vmul.f32 %v1534_v57, %v1320_v56  ;;  %vm1327_vm0 = vweird.f32 %v1534_v57 }
 0x414   :  { %vm1328_vm2 = vmor %vm1326_vm1, %vm1327_vm0 }
 0x415   :  { %v1323_v59 = vsub.f32 1.0, %v1322_v58 }
 0x417   :  { %v1324_v61 = vmul.f32 %v1534_v57, %v1323_v59 }
 0x419   :  { %v1325_v0 = vadd.f32 %v1534_v57, %v1324_v61 }
 0x41b   :  { %v1329_v47 = vsel %vm1328_vm2, %v1534_v57, %v1325_v0 }
 0x41c   :  { %v1334_v5 = vsel %vm1331_vm3, %v1333_v1, %v1329_v47 }
 0x41d   :  { %v1335_v10 = vmul.f32 %v1532_v55, %v1334_v5 }
 0x41f   :  { %1336 = vst [vmem:[%s2162_s5] sm:$0xff] %v1335_v10 }

</bundles_post_ra>
